<compile_context>
chip_gen: v5e
topology: v5e:2x2
jax: 0.10.0
libtpu: 0.0.40
codegen_flags: <defaults>
</compile_context>

<pallas_src>
import functools

import jax
import jax.numpy as jnp
from jax.experimental import pallas as pl
from jax.experimental.pallas import tpu as pltpu

# ---------------- Config (small, deterministic) ----------------
N_LAYER = 2
N_HEAD = 2
D_MODEL = 32
D_HEAD = D_MODEL // N_HEAD       # 16
D_INNER = 64
QLEN = 8
BSZ = 2
MEM_LEN = 8
EXT_LEN = 0
LN_EPS = 1e-5
SCALE = 1.0 / (D_HEAD ** 0.5)
NEG_INF = -1e30                  # large finite negative (safer than -inf)

# TODO(synk): the `Embedding` class is not given in the reference file; it is
# modeled here as per-stream lookup tables (padding row = 0) summed to d_model,
# exposing tempo/bar/pos/token/dur sizes and total_size like the original.
CLASSES = ['Tempo', 'Bar', 'Position', 'Token', 'Duration']
VOCAB = {'Tempo': 12, 'Bar': 8, 'Position': 16, 'Token': 20, 'Duration': 10}
TOTAL_SIZE = sum(VOCAB[c] for c in CLASSES)
OFFSETS = {}
_o = 0
for _c in CLASSES:
    OFFSETS[_c] = _o
    _o += VOCAB[_c]

_VMEM = pl.BlockSpec(memory_space=pltpu.MemorySpace.VMEM)


# ---------------- Pallas kernels ----------------
def _embed_kernel(idx_ref, table_ref, o_ref):
    """Sum of 5 per-stream embedding lookups via a single multi-hot matmul.

    idx_ref:   (N, 5) int32, already offset into the concatenated vocab.
    table_ref: (TOTAL_SIZE, D_MODEL) f32 (padding rows are zero).
    """
    n = idx_ref.shape[0]
    v = table_ref.shape[0]
    col = jax.lax.broadcasted_iota(jnp.int32, (n, v), 1)
    multihot = jnp.zeros((n, v), jnp.float32)
    for c in range(idx_ref.shape[1]):
        multihot = multihot + (col == idx_ref[:, c:c + 1]).astype(jnp.float32)
    o_ref[...] = jnp.dot(multihot, table_ref[...],
                         preferred_element_type=jnp.float32)


def pallas_embedding(idx, table):
    n = idx.shape[0]
    return pl.pallas_call(
        _embed_kernel,
        out_shape=jax.ShapeDtypeStruct((n, D_MODEL), jnp.float32),
        in_specs=[_VMEM, _VMEM], out_specs=_VMEM)(idx, table)


def _decoder_layer_kernel(w_ref, pos_ref, qkv_w_ref, r_w_ref, o_w_ref,
                          rwb_ref, rrb_ref, ln1_g_ref, ln1_b_ref,
                          ff_w1_ref, ff_b1_ref, ff_w2_ref, ff_b2_ref,
                          ln2_g_ref, ln2_b_ref, o_ref):
    """One fused RelPartialLearnableDecoderLayer for a single batch element.

    w_ref: (qlen, d_model) hidden state for one batch (grid is over batch).
    """
    q = w_ref.shape[0]
    k = pos_ref.shape[0]
    n_head, d_head = rwb_ref.shape

    w = w_ref[...]                                                   # (q, dm)
    w_heads = jnp.dot(w, qkv_w_ref[...],
                      preferred_element_type=jnp.float32)            # (q, 3*nh*dh)
    r_head_k = jnp.dot(pos_ref[...], r_w_ref[...],
                       preferred_element_type=jnp.float32)           # (k, nh*dh)

    row = jax.lax.broadcasted_iota(jnp.int32, (q, k), 0)
    col = jax.lax.broadcasted_iota(jnp.int32, (q, k), 1)
    causal_mask = col > row            # triu(ones, diagonal=1+mlen), mlen == 0

    dn = (((1,), (1,)), ((), ()))      # contract last dims (rhs transposed)
    head_outs = []
    for h in range(n_head):
        q_h = w_heads[:, h * d_head:(h + 1) * d_head]
        k_h = w_heads[:, n_head * d_head + h * d_head:
                      n_head * d_head + (h + 1) * d_head]
        v_h = w_heads[:, 2 * n_head * d_head + h * d_head:
                      2 * n_head * d_head + (h + 1) * d_head]
        r_h = r_head_k[:, h * d_head:(h + 1) * d_head]

        rw_q = q_h + rwb_ref[h:h + 1, :]
        rr_q = q_h + rrb_ref[h:h + 1, :]

        ac = jax.lax.dot_general(rw_q, k_h, dn,
                                 preferred_element_type=jnp.float32)  # (q, k)
        bd = jax.lax.dot_general(rr_q, r_h, dn,
                                 preferred_element_type=jnp.float32)  # (q, k)

        # Transformer-XL rel_shift done in-kernel with static slices.
        # For the unmasked (causal) region: bd_shift[i, j] = bd[i, k-1+j-i].
        # Entries in the masked region are irrelevant (set to 0, then masked).
        # TODO(synk): valid for mlen == 0 (q == k); mems > 0 path not exercised.
        bdp = jnp.concatenate([bd, jnp.zeros((q, k), jnp.float32)], axis=1)
        shifted_rows = [bdp[i:i + 1, k - 1 - i: 2 * k - 1 - i] for i in range(q)]
        bd_shift = jnp.concatenate(shifted_rows, axis=0)               # (q, k)

        score = (ac + bd_shift) * SCALE
        score = jnp.where(causal_mask, NEG_INF, score)
        m = jnp.max(score, axis=-1, keepdims=True)
        p = jnp.exp(score - m)
        p = p * pl.reciprocal(jnp.sum(p, axis=-1, keepdims=True), approx=True)
        head_outs.append(jnp.dot(p, v_h,
                                 preferred_element_type=jnp.float32))  # (q, dh)

    attn_vec = jnp.concatenate(head_outs, axis=1)                      # (q, nh*dh)
    attn_out = jnp.dot(attn_vec, o_w_ref[...],
                       preferred_element_type=jnp.float32)             # (q, dm)

    # post-lnorm residual 1
    z1 = w + attn_out
    mu1 = jnp.mean(z1, axis=-1, keepdims=True)
    var1 = jnp.mean((z1 - mu1) ** 2, axis=-1, keepdims=True)
    out1 = (z1 - mu1) * jax.lax.rsqrt(var1 + LN_EPS) * ln1_g_ref[...] + ln1_b_ref[...]

    # Positionwise FFN
    h1 = jnp.dot(out1, ff_w1_ref[...],
                 preferred_element_type=jnp.float32) + ff_b1_ref[...]
    h1 = jnp.maximum(h1, 0.0)
    h2 = jnp.dot(h1, ff_w2_ref[...],
                 preferred_element_type=jnp.float32) + ff_b2_ref[...]

    # post-lnorm residual 2
    z2 = out1 + h2
    mu2 = jnp.mean(z2, axis=-1, keepdims=True)
    var2 = jnp.mean((z2 - mu2) ** 2, axis=-1, keepdims=True)
    o_ref[...] = (z2 - mu2) * jax.lax.rsqrt(var2 + LN_EPS) * ln2_g_ref[...] + ln2_b_ref[...]


def pallas_decoder_layer(w, pos_emb, lp, r_w_bias, r_r_bias):
    """w: (bsz*qlen, d_model) batch-major hidden state -> same shape."""
    n, d = w.shape
    full = lambda b: (0, 0)
    in_specs = [
        pl.BlockSpec((QLEN, D_MODEL), lambda b: (b, 0)),     # hidden (per batch)
        pl.BlockSpec((QLEN, D_MODEL), full),                 # pos_emb (klen==qlen)
        pl.BlockSpec((D_MODEL, 3 * N_HEAD * D_HEAD), full),  # qkv_w
        pl.BlockSpec((D_MODEL, N_HEAD * D_HEAD), full),      # r_w
        pl.BlockSpec((N_HEAD * D_HEAD, D_MODEL), full),      # o_w
        pl.BlockSpec((N_HEAD, D_HEAD), full),                # r_w_bias
        pl.BlockSpec((N_HEAD, D_HEAD), full),                # r_r_bias
        pl.BlockSpec((1, D_MODEL), full),                    # ln1_g
        pl.BlockSpec((1, D_MODEL), full),                    # ln1_b
        pl.BlockSpec((D_MODEL, D_INNER), full),              # ff_w1
        pl.BlockSpec((1, D_INNER), full),                    # ff_b1
        pl.BlockSpec((D_INNER, D_MODEL), full),              # ff_w2
        pl.BlockSpec((1, D_MODEL), full),                    # ff_b2
        pl.BlockSpec((1, D_MODEL), full),                    # ln2_g
        pl.BlockSpec((1, D_MODEL), full),                    # ln2_b
    ]
    return pl.pallas_call(
        _decoder_layer_kernel,
        out_shape=jax.ShapeDtypeStruct((n, d), jnp.float32),
        grid=(BSZ,),
        in_specs=in_specs,
        out_specs=pl.BlockSpec((QLEN, D_MODEL), lambda b: (b, 0)),
        compiler_params=pltpu.CompilerParams(
            dimension_semantics=("parallel",)),
    )(w, pos_emb, lp['qkv_w'], lp['r_w'], lp['o_w'],
      r_w_bias, r_r_bias,
      lp['ln1_g'].reshape(1, D_MODEL), lp['ln1_b'].reshape(1, D_MODEL),
      lp['ff_w1'], lp['ff_b1'].reshape(1, D_INNER),
      lp['ff_w2'], lp['ff_b2'].reshape(1, D_MODEL),
      lp['ln2_g'].reshape(1, D_MODEL), lp['ln2_b'].reshape(1, D_MODEL))


def _proj_ce_kernel(h_ref, pw_ref, pb_ref, tgt_ref, mask_ref, o_ref):
    """Final projection fused with 5-stream masked cross-entropy -> (1,1) loss.

    h_ref:    (N, d_model)      hidden states (batch-major)
    pw_ref:   (d_model, TOTAL)  projection weight
    pb_ref:   (1, TOTAL)        projection bias
    tgt_ref:  (N, 5) int32      targets, offset into the concatenated vocab
    mask_ref: (N, 1) f32        loss mask
    """
    n = h_ref.shape[0]
    v = pw_ref.shape[1]
    logits = jnp.dot(h_ref[...], pw_ref[...],
                     preferred_element_type=jnp.float32) + pb_ref[...]   # (N, V)
    col = jax.lax.broadcasted_iota(jnp.int32, (n, v), 1)
    mask = mask_ref[...]

    total = jnp.zeros((1, 1), jnp.float32)
    off = 0
    for c_i, c in enumerate(CLASSES):
        sz = VOCAB[c]
        in_seg = jnp.logical_and(col >= off, col < off + sz)
        seg_logits = jnp.where(in_seg, logits, NEG_INF)
        m = jnp.max(seg_logits, axis=-1, keepdims=True)
        lse = jnp.log(jnp.sum(jnp.exp(seg_logits - m), axis=-1,
                              keepdims=True)) + m                        # (N, 1)
        onehot = (col == tgt_ref[:, c_i:c_i + 1]).astype(jnp.float32)
        tgt_logit = jnp.sum(logits * onehot, axis=-1, keepdims=True)     # (N, 1)
        nll = lse - tgt_logit
        masked = nll * mask
        total = total + jnp.sum(jnp.sum(masked, axis=1, keepdims=True),
                                axis=0, keepdims=True)
        off += sz
    msum = jnp.sum(jnp.sum(mask, axis=1, keepdims=True), axis=0, keepdims=True)
    # per-class loss is sum(nll*mask)/sum(mask); summing classes first then
    # dividing once is algebraically identical.
    o_ref[...] = total / msum


def pallas_proj_ce(hidden, proj_w, proj_b, tgt, mask):
    return pl.pallas_call(
        _proj_ce_kernel,
        out_shape=jax.ShapeDtypeStruct((1, 1), jnp.float32),
        in_specs=[_VMEM] * 5, out_specs=_VMEM)(
            hidden, proj_w, proj_b.reshape(1, TOTAL_SIZE), tgt, mask)


# ---------------- Parameter init (deterministic) ----------------
def init_params(key):
    p = {}
    ks = jax.random.split(key, 64)
    ki = iter(range(64))

    def nrm(shape, scale=0.02):
        return scale * jax.random.normal(ks[next(ki)], shape, dtype=jnp.float32)

    # word embedding tables (padding_idx = 0 row zeroed)
    p['emb'] = {}
    for c in CLASSES:
        tbl = nrm((VOCAB[c], D_MODEL))
        p['emb'][c] = tbl.at[0].set(0.0)

    p['r_w_bias'] = nrm((N_HEAD, D_HEAD))
    p['r_r_bias'] = nrm((N_HEAD, D_HEAD))

    layers = []
    for _ in range(N_LAYER):
        lp = dict(
            qkv_w=nrm((D_MODEL, 3 * N_HEAD * D_HEAD)),
            r_w=nrm((D_MODEL, N_HEAD * D_HEAD)),
            o_w=nrm((N_HEAD * D_HEAD, D_MODEL)),
            ln1_g=jnp.ones((D_MODEL,), jnp.float32),
            ln1_b=jnp.zeros((D_MODEL,), jnp.float32),
            ff_w1=nrm((D_MODEL, D_INNER)),
            ff_b1=jnp.zeros((D_INNER,), jnp.float32),
            ff_w2=nrm((D_INNER, D_MODEL)),
            ff_b2=jnp.zeros((D_MODEL,), jnp.float32),
            ln2_g=jnp.ones((D_MODEL,), jnp.float32),
            ln2_b=jnp.zeros((D_MODEL,), jnp.float32),
        )
        layers.append(lp)
    p['layers'] = layers

    p['proj_w'] = nrm((D_MODEL, TOTAL_SIZE))
    p['proj_b'] = jnp.zeros((TOTAL_SIZE,), jnp.float32)
    return p


# ---------------- Model glue ----------------
def positional_embedding(klen):
    inv_freq = 1.0 / (10000.0 ** (jnp.arange(0, D_MODEL, 2, dtype=jnp.float32)
                                  / D_MODEL))
    pos_seq = jnp.arange(klen - 1, -1, -1, dtype=jnp.float32)
    sinusoid = pos_seq[:, None] * inv_freq[None, :]
    return jnp.concatenate([jnp.sin(sinusoid), jnp.cos(sinusoid)], axis=-1)


@jax.jit
def mem_transformer_forward(params, data, target, loss_mask):
    """data/target: dicts of (qlen, bsz) int32; loss_mask: (bsz, qlen) f32.
    Returns (scalar loss, new_mems list) like MemTransformerLM.forward."""
    qlen, bsz = data['Token'].shape
    n = bsz * qlen
    mlen = 0                       # init_mems -> empty mems
    klen = mlen + qlen

    # batch-major token ordering (row = b*qlen + i); indices offset into the
    # concatenated 66-wide vocab so a single table / single logit slab is used.
    idx = jnp.stack(
        [data[c].transpose(1, 0).reshape(n) + OFFSETS[c] for c in CLASSES],
        axis=1).astype(jnp.int32)                                       # (n, 5)
    table = jnp.concatenate([params['emb'][c] for c in CLASSES], axis=0)

    word_emb = pallas_embedding(idx, table)          # (n, d_model), dropout p=0

    pos_emb = positional_embedding(klen)             # (klen, d_model)

    core = word_emb
    hids = [core]
    for lp in params['layers']:
        core = pallas_decoder_layer(core, pos_emb, lp,
                                    params['r_w_bias'], params['r_r_bias'])
        hids.append(core)

    # _update_mems with empty mems: new_mems[i] = hids[i][beg:end] (seq-first)
    end_idx = mlen + max(0, qlen - EXT_LEN)
    beg_idx = max(0, end_idx - MEM_LEN)

    def seq_first(x):
        return x.reshape(bsz, qlen, D_MODEL).transpose(1, 0, 2)

    new_mems = [jax.lax.stop_gradient(seq_first(h)[beg_idx:end_idx])
                for h in hids]

    tgt = jnp.stack(
        [target[c].transpose(1, 0).reshape(n) + OFFSETS[c] for c in CLASSES],
        axis=1).astype(jnp.int32)                                       # (n, 5)
    maskf = loss_mask.reshape(n, 1).astype(jnp.float32)

    loss = pallas_proj_ce(core, params['proj_w'], params['proj_b'],
                          tgt, maskf)[0, 0]
    return loss, new_mems


# ---------------- Main ----------------
if __name__ == "__main__":
    key = jax.random.PRNGKey(0)
    kp, kd, kt = jax.random.split(key, 3)

    params = init_params(kp)

    data, target = {}, {}
    dkeys = jax.random.split(kd, len(CLASSES))
    tkeys = jax.random.split(kt, len(CLASSES))
    for i, c in enumerate(CLASSES):
        data[c] = jax.random.randint(dkeys[i], (QLEN, BSZ), 1, VOCAB[c],
                                     dtype=jnp.int32)
        target[c] = jax.random.randint(tkeys[i], (QLEN, BSZ), 1, VOCAB[c],
                                       dtype=jnp.int32)
    loss_mask = jnp.ones((BSZ, QLEN), jnp.float32)

    loss, new_mems = mem_transformer_forward(params, data, target, loss_mask)
    jax.block_until_ready(loss)
    for m in new_mems:
        jax.block_until_ready(m)

    assert loss.shape == ()
    assert bool(jnp.isfinite(loss))
    assert len(new_mems) == N_LAYER + 1
    assert all(m.shape == (QLEN, BSZ, D_MODEL) for m in new_mems)
    print("KERNEL_OK")
</pallas_src>

<mosaic_0001>
module attributes {stable_mosaic.version = 11 : i64} {
  func.func @_embed_kernel(%arg0: memref<16x5xi32, #tpu.memory_space<vmem>>, %arg1: memref<66x32xf32, #tpu.memory_space<vmem>>, %arg2: memref<16x32xf32, #tpu.memory_space<vmem>>) attributes {dimension_semantics = [], scalar_prefetch = 0 : i64, scratch_operands = 0 : i64, tpu.core_type = #tpu.core_type<tc>} {
    %0 = tpu.iota {dimensions = array<i32: 1>} : vector<16x66xi32>
    %cst = arith.constant 0.000000e+00 : f32
    %1 = vector.broadcast %cst : f32 to vector<16x66xf32>
    %c0 = arith.constant 0 : index
    %c0_0 = arith.constant 0 : index
    %2 = vector.load %arg0[%c0, %c0_0] : memref<16x5xi32, #tpu.memory_space<vmem>>, vector<16x1xi32>
    %3 = vector.broadcast %2 : vector<16x1xi32> to vector<16x66xi32>
    %4 = arith.cmpi eq, %0, %3 : vector<16x66xi32>
    %5 = arith.extui %4 : vector<16x66xi1> to vector<16x66xi32>
    %6 = arith.sitofp %5 : vector<16x66xi32> to vector<16x66xf32>
    %7 = arith.addf %1, %6 : vector<16x66xf32>
    %c0_1 = arith.constant 0 : index
    %c1 = arith.constant 1 : index
    %8 = vector.load %arg0[%c0_1, %c1] : memref<16x5xi32, #tpu.memory_space<vmem>>, vector<16x1xi32>
    %9 = vector.broadcast %8 : vector<16x1xi32> to vector<16x66xi32>
    %10 = arith.cmpi eq, %0, %9 : vector<16x66xi32>
    %11 = arith.extui %10 : vector<16x66xi1> to vector<16x66xi32>
    %12 = arith.sitofp %11 : vector<16x66xi32> to vector<16x66xf32>
    %13 = arith.addf %7, %12 : vector<16x66xf32>
    %c0_2 = arith.constant 0 : index
    %c2 = arith.constant 2 : index
    %14 = vector.load %arg0[%c0_2, %c2] : memref<16x5xi32, #tpu.memory_space<vmem>>, vector<16x1xi32>
    %15 = vector.broadcast %14 : vector<16x1xi32> to vector<16x66xi32>
    %16 = arith.cmpi eq, %0, %15 : vector<16x66xi32>
    %17 = arith.extui %16 : vector<16x66xi1> to vector<16x66xi32>
    %18 = arith.sitofp %17 : vector<16x66xi32> to vector<16x66xf32>
    %19 = arith.addf %13, %18 : vector<16x66xf32>
    %c0_3 = arith.constant 0 : index
    %c3 = arith.constant 3 : index
    %20 = vector.load %arg0[%c0_3, %c3] : memref<16x5xi32, #tpu.memory_space<vmem>>, vector<16x1xi32>
    %21 = vector.broadcast %20 : vector<16x1xi32> to vector<16x66xi32>
    %22 = arith.cmpi eq, %0, %21 : vector<16x66xi32>
    %23 = arith.extui %22 : vector<16x66xi1> to vector<16x66xi32>
    %24 = arith.sitofp %23 : vector<16x66xi32> to vector<16x66xf32>
    %25 = arith.addf %19, %24 : vector<16x66xf32>
    %c0_4 = arith.constant 0 : index
    %c4 = arith.constant 4 : index
    %26 = vector.load %arg0[%c0_4, %c4] : memref<16x5xi32, #tpu.memory_space<vmem>>, vector<16x1xi32>
    %27 = vector.broadcast %26 : vector<16x1xi32> to vector<16x66xi32>
    %28 = arith.cmpi eq, %0, %27 : vector<16x66xi32>
    %29 = arith.extui %28 : vector<16x66xi1> to vector<16x66xi32>
    %30 = arith.sitofp %29 : vector<16x66xi32> to vector<16x66xf32>
    %31 = arith.addf %25, %30 : vector<16x66xf32>
    %c0_5 = arith.constant 0 : index
    %c0_6 = arith.constant 0 : index
    %32 = vector.load %arg1[%c0_5, %c0_6] : memref<66x32xf32, #tpu.memory_space<vmem>>, vector<66x32xf32>
    %cst_7 = arith.constant dense<0.000000e+00> : vector<16x32xf32>
    %33 = tpu.matmul %31, %32, %cst_7 {dimension_numbers = #tpu.dot_dimension_numbers<[1], [0], [0], [1], [0, 0, 1, 1], [], []>} : vector<16x66xf32>, vector<66x32xf32>, vector<16x32xf32> -> vector<16x32xf32>
    %c0_8 = arith.constant 0 : index
    %c0_9 = arith.constant 0 : index
    %34 = vector.load %arg2[%c0_8, %c0_9] : memref<16x32xf32, #tpu.memory_space<vmem>>, vector<16x32xf32>
    tpu.vector_store %arg2[%c0_8, %c0_9], %33 {strides = array<i32>} : memref<16x32xf32, #tpu.memory_space<vmem>>, vector<16x32xf32>,
    return
  }
}

module attributes {stable_mosaic.version = 11 : i64} {
  func.func @_decoder_layer_kernel(%arg0: i32, %arg1: memref<8x32xf32, #tpu.memory_space<vmem>>, %arg2: memref<8x32xf32, #tpu.memory_space<vmem>>, %arg3: memref<32x96xf32, #tpu.memory_space<vmem>>, %arg4: memref<32x32xf32, #tpu.memory_space<vmem>>, %arg5: memref<32x32xf32, #tpu.memory_space<vmem>>, %arg6: memref<2x16xf32, #tpu.memory_space<vmem>>, %arg7: memref<2x16xf32, #tpu.memory_space<vmem>>, %arg8: memref<1x32xf32, #tpu.memory_space<vmem>>, %arg9: memref<1x32xf32, #tpu.memory_space<vmem>>, %arg10: memref<32x64xf32, #tpu.memory_space<vmem>>, %arg11: memref<1x64xf32, #tpu.memory_space<vmem>>, %arg12: memref<64x32xf32, #tpu.memory_space<vmem>>, %arg13: memref<1x32xf32, #tpu.memory_space<vmem>>, %arg14: memref<1x32xf32, #tpu.memory_space<vmem>>, %arg15: memref<1x32xf32, #tpu.memory_space<vmem>>, %arg16: memref<8x32xf32, #tpu.memory_space<vmem>>) attributes {dimension_semantics = [#tpu.dimension_semantics<parallel>], iteration_bounds = array<i64: 2>, scalar_prefetch = 0 : i64, scratch_operands = 0 : i64, tpu.core_type = #tpu.core_type<tc>, window_params = [{transform_indices = @transform_0, window_bounds = array<i64: 8, 32>}, {pipeline_mode = #tpu.pipeline_mode<synchronous>, transform_indices = @transform_1, window_bounds = array<i64: 8, 32>}, {pipeline_mode = #tpu.pipeline_mode<synchronous>, transform_indices = @transform_2, window_bounds = array<i64: 32, 96>}, {pipeline_mode = #tpu.pipeline_mode<synchronous>, transform_indices = @transform_3, window_bounds = array<i64: 32, 32>}, {pipeline_mode = #tpu.pipeline_mode<synchronous>, transform_indices = @transform_4, window_bounds = array<i64: 32, 32>}, {pipeline_mode = #tpu.pipeline_mode<synchronous>, transform_indices = @transform_5, window_bounds = array<i64: 2, 16>}, {pipeline_mode = #tpu.pipeline_mode<synchronous>, transform_indices = @transform_6, window_bounds = array<i64: 2, 16>}, {pipeline_mode = #tpu.pipeline_mode<synchronous>, transform_indices = @transform_7, window_bounds = array<i64: 1, 32>}, {pipeline_mode = #tpu.pipeline_mode<synchronous>, transform_indices = @transform_8, window_bounds = array<i64: 1, 32>}, {pipeline_mode = #tpu.pipeline_mode<synchronous>, transform_indices = @transform_9, window_bounds = array<i64: 32, 64>}, {pipeline_mode = #tpu.pipeline_mode<synchronous>, transform_indices = @transform_10, window_bounds = array<i64: 1, 64>}, {pipeline_mode = #tpu.pipeline_mode<synchronous>, transform_indices = @transform_11, window_bounds = array<i64: 64, 32>}, {pipeline_mode = #tpu.pipeline_mode<synchronous>, transform_indices = @transform_12, window_bounds = array<i64: 1, 32>}, {pipeline_mode = #tpu.pipeline_mode<synchronous>, transform_indices = @transform_13, window_bounds = array<i64: 1, 32>}, {pipeline_mode = #tpu.pipeline_mode<synchronous>, transform_indices = @transform_14, window_bounds = array<i64: 1, 32>}, {transform_indices = @transform_15, window_bounds = array<i64: 8, 32>}]} {
    %c0 = arith.constant 0 : index
    %c0_0 = arith.constant 0 : index
    %0 = vector.load %arg1[%c0, %c0_0] : memref<8x32xf32, #tpu.memory_space<vmem>>, vector<8x32xf32>
    %c0_1 = arith.constant 0 : index
    %c0_2 = arith.constant 0 : index
    %1 = vector.load %arg3[%c0_1, %c0_2] : memref<32x96xf32, #tpu.memory_space<vmem>>, vector<32x96xf32>
    %cst = arith.constant dense<0.000000e+00> : vector<8x96xf32>
    %2 = tpu.matmul %0, %1, %cst {dimension_numbers = #tpu.dot_dimension_numbers<[1], [0], [0], [1], [0, 0, 1, 1], [], []>} : vector<8x32xf32>, vector<32x96xf32>, vector<8x96xf32> -> vector<8x96xf32>
    %c0_3 = arith.constant 0 : index
    %c0_4 = arith.constant 0 : index
    %3 = vector.load %arg2[%c0_3, %c0_4] : memref<8x32xf32, #tpu.memory_space<vmem>>, vector<8x32xf32>
    %c0_5 = arith.constant 0 : index
    %c0_6 = arith.constant 0 : index
    %4 = vector.load %arg4[%c0_5, %c0_6] : memref<32x32xf32, #tpu.memory_space<vmem>>, vector<32x32xf32>
    %cst_7 = arith.constant dense<0.000000e+00> : vector<8x32xf32>
    %5 = tpu.matmul %3, %4, %cst_7 {dimension_numbers = #tpu.dot_dimension_numbers<[1], [0], [0], [1], [0, 0, 1, 1], [], []>} : vector<8x32xf32>, vector<32x32xf32>, vector<8x32xf32> -> vector<8x32xf32>
    %6 = tpu.iota {dimensions = array<i32: 0>} : vector<8x8xi32>
    %7 = tpu.iota {dimensions = array<i32: 1>} : vector<8x8xi32>
    %8 = arith.cmpi sgt, %7, %6 : vector<8x8xi32>
    %9 = vector.extract_strided_slice %2 {offsets = [0, 0], sizes = [8, 16], strides = [1, 1]} : vector<8x96xf32> to vector<8x16xf32>
    %10 = vector.extract_strided_slice %2 {offsets = [0, 32], sizes = [8, 16], strides = [1, 1]} : vector<8x96xf32> to vector<8x16xf32>
    %11 = vector.extract_strided_slice %2 {offsets = [0, 64], sizes = [8, 16], strides = [1, 1]} : vector<8x96xf32> to vector<8x16xf32>
    %12 = vector.extract_strided_slice %5 {offsets = [0, 0], sizes = [8, 16], strides = [1, 1]} : vector<8x32xf32> to vector<8x16xf32>
    %c0_8 = arith.constant 0 : index
    %c0_9 = arith.constant 0 : index
    %13 = vector.load %arg6[%c0_8, %c0_9] : memref<2x16xf32, #tpu.memory_space<vmem>>, vector<1x16xf32>
    %14 = vector.broadcast %13 : vector<1x16xf32> to vector<8x16xf32>
    %15 = arith.addf %9, %14 : vector<8x16xf32>
    %c0_10 = arith.constant 0 : index
    %c0_11 = arith.constant 0 : index
    %16 = vector.load %arg7[%c0_10, %c0_11] : memref<2x16xf32, #tpu.memory_space<vmem>>, vector<1x16xf32>
    %17 = vector.broadcast %16 : vector<1x16xf32> to vector<8x16xf32>
    %18 = arith.addf %9, %17 : vector<8x16xf32>
    %cst_12 = arith.constant dense<0.000000e+00> : vector<8x8xf32>
    %19 = tpu.matmul %15, %10, %cst_12 {dimension_numbers = #tpu.dot_dimension_numbers<[1], [1], [0], [0], [0, 0, 1, 0], [], []>} : vector<8x16xf32>, vector<8x16xf32>, vector<8x8xf32> -> vector<8x8xf32>
    %cst_13 = arith.constant dense<0.000000e+00> : vector<8x8xf32>
    %20 = tpu.matmul %18, %12, %cst_13 {dimension_numbers = #tpu.dot_dimension_numbers<[1], [1], [0], [0], [0, 0, 1, 0], [], []>} : vector<8x16xf32>, vector<8x16xf32>, vector<8x8xf32> -> vector<8x8xf32>
    %cst_14 = arith.constant 0.000000e+00 : f32
    %21 = vector.broadcast %cst_14 : f32 to vector<8x8xf32>
    %22 = tpu.concatenate %20, %21 in 1 : vector<8x8xf32>, vector<8x8xf32> -> vector<8x16xf32>
    %23 = vector.extract_strided_slice %22 {offsets = [0, 7], sizes = [1, 8], strides = [1, 1]} : vector<8x16xf32> to vector<1x8xf32>
    %24 = vector.extract_strided_slice %22 {offsets = [1, 6], sizes = [1, 8], strides = [1, 1]} : vector<8x16xf32> to vector<1x8xf32>
    %25 = vector.extract_strided_slice %22 {offsets = [2, 5], sizes = [1, 8], strides = [1, 1]} : vector<8x16xf32> to vector<1x8xf32>
    %26 = vector.extract_strided_slice %22 {offsets = [3, 4], sizes = [1, 8], strides = [1, 1]} : vector<8x16xf32> to vector<1x8xf32>
    %27 = vector.extract_strided_slice %22 {offsets = [4, 3], sizes = [1, 8], strides = [1, 1]} : vector<8x16xf32> to vector<1x8xf32>
    %28 = vector.extract_strided_slice %22 {offsets = [5, 2], sizes = [1, 8], strides = [1, 1]} : vector<8x16xf32> to vector<1x8xf32>
    %29 = vector.extract_strided_slice %22 {offsets = [6, 1], sizes = [1, 8], strides = [1, 1]} : vector<8x16xf32> to vector<1x8xf32>
    %30 = vector.extract_strided_slice %22 {offsets = [7, 0], sizes = [1, 8], strides = [1, 1]} : vector<8x16xf32> to vector<1x8xf32>
    %31 = tpu.concatenate %23, %24, %25, %26, %27, %28, %29, %30 in 0 : vector<1x8xf32>, vector<1x8xf32>, vector<1x8xf32>, vector<1x8xf32>, vector<1x8xf32>, vector<1x8xf32>, vector<1x8xf32>, vector<1x8xf32> -> vector<8x8xf32>
    %32 = arith.addf %19, %31 : vector<8x8xf32>
    %cst_15 = arith.constant 2.500000e-01 : f32
    %33 = vector.broadcast %cst_15 : f32 to vector<8x8xf32>
    %34 = arith.mulf %32, %33 : vector<8x8xf32>
    %cst_16 = arith.constant -1.000000e+30 : f32
    %35 = vector.broadcast %cst_16 : f32 to vector<8x8xf32>
    %36 = arith.select %8, %35, %34 : vector<8x8xi1>, vector<8x8xf32>
    %cst_17 = arith.constant dense<0xFF800000> : vector<8xf32>
    %37 = vector.multi_reduction <maximumf>, %36, %cst_17 [1] : vector<8x8xf32> to vector<8xf32>
    %38 = vector.shape_cast %37 : vector<8xf32> to vector<8x1xf32>
    %39 = vector.broadcast %38 : vector<8x1xf32> to vector<8x8xf32>
    %40 = arith.subf %36, %39 : vector<8x8xf32>
    %41 = math.exp %40 : vector<8x8xf32>
    %cst_18 = arith.constant dense<0.000000e+00> : vector<8xf32>
    %42 = vector.multi_reduction <add>, %41, %cst_18 [1] : vector<8x8xf32> to vector<8xf32>
    %43 = vector.shape_cast %42 : vector<8xf32> to vector<8x1xf32>
    %44 = tpu.reciprocal %43 {approx = true} : vector<8x1xf32> -> vector<8x1xf32>
    %45 = vector.broadcast %44 : vector<8x1xf32> to vector<8x8xf32>
    %46 = arith.mulf %41, %45 : vector<8x8xf32>
    %cst_19 = arith.constant dense<0.000000e+00> : vector<8x16xf32>
    %47 = tpu.matmul %46, %11, %cst_19 {dimension_numbers = #tpu.dot_dimension_numbers<[1], [0], [0], [1], [0, 0, 1, 1], [], []>} : vector<8x8xf32>, vector<8x16xf32>, vector<8x16xf32> -> vector<8x16xf32>
    %48 = vector.extract_strided_slice %2 {offsets = [0, 16], sizes = [8, 16], strides = [1, 1]} : vector<8x96xf32> to vector<8x16xf32>
    %49 = vector.extract_strided_slice %2 {offsets = [0, 48], sizes = [8, 16], strides = [1, 1]} : vector<8x96xf32> to vector<8x16xf32>
    %50 = vector.extract_strided_slice %2 {offsets = [0, 80], sizes = [8, 16], strides = [1, 1]} : vector<8x96xf32> to vector<8x16xf32>
    %51 = vector.extract_strided_slice %5 {offsets = [0, 16], sizes = [8, 16], strides = [1, 1]} : vector<8x32xf32> to vector<8x16xf32>
    %c1 = arith.constant 1 : index
    %c0_20 = arith.constant 0 : index
    %52 = vector.load %arg6[%c1, %c0_20] : memref<2x16xf32, #tpu.memory_space<vmem>>, vector<1x16xf32>
    %53 = vector.broadcast %52 : vector<1x16xf32> to vector<8x16xf32>
    %54 = arith.addf %48, %53 : vector<8x16xf32>
    %c1_21 = arith.constant 1 : index
    %c0_22 = arith.constant 0 : index
    %55 = vector.load %arg7[%c1_21, %c0_22] : memref<2x16xf32, #tpu.memory_space<vmem>>, vector<1x16xf32>
    %56 = vector.broadcast %55 : vector<1x16xf32> to vector<8x16xf32>
    %57 = arith.addf %48, %56 : vector<8x16xf32>
    %cst_23 = arith.constant dense<0.000000e+00> : vector<8x8xf32>
    %58 = tpu.matmul %54, %49, %cst_23 {dimension_numbers = #tpu.dot_dimension_numbers<[1], [1], [0], [0], [0, 0, 1, 0], [], []>} : vector<8x16xf32>, vector<8x16xf32>, vector<8x8xf32> -> vector<8x8xf32>
    %cst_24 = arith.constant dense<0.000000e+00> : vector<8x8xf32>
    %59 = tpu.matmul %57, %51, %cst_24 {dimension_numbers = #tpu.dot_dimension_numbers<[1], [1], [0], [0], [0, 0, 1, 0], [], []>} : vector<8x16xf32>, vector<8x16xf32>, vector<8x8xf32> -> vector<8x8xf32>
    %cst_25 = arith.constant 0.000000e+00 : f32
    %60 = vector.broadcast %cst_25 : f32 to vector<8x8xf32>
    %61 = tpu.concatenate %59, %60 in 1 : vector<8x8xf32>, vector<8x8xf32> -> vector<8x16xf32>
    %62 = vector.extract_strided_slice %61 {offsets = [0, 7], sizes = [1, 8], strides = [1, 1]} : vector<8x16xf32> to vector<1x8xf32>
    %63 = vector.extract_strided_slice %61 {offsets = [1, 6], sizes = [1, 8], strides = [1, 1]} : vector<8x16xf32> to vector<1x8xf32>
    %64 = vector.extract_strided_slice %61 {offsets = [2, 5], sizes = [1, 8], strides = [1, 1]} : vector<8x16xf32> to vector<1x8xf32>
    %65 = vector.extract_strided_slice %61 {offsets = [3, 4], sizes = [1, 8], strides = [1, 1]} : vector<8x16xf32> to vector<1x8xf32>
    %66 = vector.extract_strided_slice %61 {offsets = [4, 3], sizes = [1, 8], strides = [1, 1]} : vector<8x16xf32> to vector<1x8xf32>
    %67 = vector.extract_strided_slice %61 {offsets = [5, 2], sizes = [1, 8], strides = [1, 1]} : vector<8x16xf32> to vector<1x8xf32>
    %68 = vector.extract_strided_slice %61 {offsets = [6, 1], sizes = [1, 8], strides = [1, 1]} : vector<8x16xf32> to vector<1x8xf32>
    %69 = vector.extract_strided_slice %61 {offsets = [7, 0], sizes = [1, 8], strides = [1, 1]} : vector<8x16xf32> to vector<1x8xf32>
    %70 = tpu.concatenate %62, %63, %64, %65, %66, %67, %68, %69 in 0 : vector<1x8xf32>, vector<1x8xf32>, vector<1x8xf32>, vector<1x8xf32>, vector<1x8xf32>, vector<1x8xf32>, vector<1x8xf32>, vector<1x8xf32> -> vector<8x8xf32>
    %71 = arith.addf %58, %70 : vector<8x8xf32>
    %cst_26 = arith.constant 2.500000e-01 : f32
    %72 = vector.broadcast %cst_26 : f32 to vector<8x8xf32>
    %73 = arith.mulf %71, %72 : vector<8x8xf32>
    %cst_27 = arith.constant -1.000000e+30 : f32
    %74 = vector.broadcast %cst_27 : f32 to vector<8x8xf32>
    %75 = arith.select %8, %74, %73 : vector<8x8xi1>, vector<8x8xf32>
    %cst_28 = arith.constant dense<0xFF800000> : vector<8xf32>
    %76 = vector.multi_reduction <maximumf>, %75, %cst_28 [1] : vector<8x8xf32> to vector<8xf32>
    %77 = vector.shape_cast %76 : vector<8xf32> to vector<8x1xf32>
    %78 = vector.broadcast %77 : vector<8x1xf32> to vector<8x8xf32>
    %79 = arith.subf %75, %78 : vector<8x8xf32>
    %80 = math.exp %79 : vector<8x8xf32>
    %cst_29 = arith.constant dense<0.000000e+00> : vector<8xf32>
    %81 = vector.multi_reduction <add>, %80, %cst_29 [1] : vector<8x8xf32> to vector<8xf32>
    %82 = vector.shape_cast %81 : vector<8xf32> to vector<8x1xf32>
    %83 = tpu.reciprocal %82 {approx = true} : vector<8x1xf32> -> vector<8x1xf32>
    %84 = vector.broadcast %83 : vector<8x1xf32> to vector<8x8xf32>
    %85 = arith.mulf %80, %84 : vector<8x8xf32>
    %cst_30 = arith.constant dense<0.000000e+00> : vector<8x16xf32>
    %86 = tpu.matmul %85, %50, %cst_30 {dimension_numbers = #tpu.dot_dimension_numbers<[1], [0], [0], [1], [0, 0, 1, 1], [], []>} : vector<8x8xf32>, vector<8x16xf32>, vector<8x16xf32> -> vector<8x16xf32>
    %87 = tpu.concatenate %47, %86 in 1 : vector<8x16xf32>, vector<8x16xf32> -> vector<8x32xf32>
    %c0_31 = arith.constant 0 : index
    %c0_32 = arith.constant 0 : index
    %88 = vector.load %arg5[%c0_31, %c0_32] : memref<32x32xf32, #tpu.memory_space<vmem>>, vector<32x32xf32>
    %cst_33 = arith.constant dense<0.000000e+00> : vector<8x32xf32>
    %89 = tpu.matmul %87, %88, %cst_33 {dimension_numbers = #tpu.dot_dimension_numbers<[1], [0], [0], [1], [0, 0, 1, 1], [], []>} : vector<8x32xf32>, vector<32x32xf32>, vector<8x32xf32> -> vector<8x32xf32>
    %90 = arith.addf %0, %89 : vector<8x32xf32>
    %cst_34 = arith.constant dense<0.000000e+00> : vector<8xf32>
    %91 = vector.multi_reduction <add>, %90, %cst_34 [1] : vector<8x32xf32> to vector<8xf32>
    %92 = vector.shape_cast %91 : vector<8xf32> to vector<8x1xf32>
    %cst_35 = arith.constant 3.200000e+01 : f32
    %93 = vector.broadcast %cst_35 : f32 to vector<8x1xf32>
    %94 = arith.divf %92, %93 : vector<8x1xf32>
    %95 = vector.broadcast %94 : vector<8x1xf32> to vector<8x32xf32>
    %96 = arith.subf %90, %95 : vector<8x32xf32>
    %97 = arith.mulf %96, %96 : vector<8x32xf32>
    %cst_36 = arith.constant dense<0.000000e+00> : vector<8xf32>
    %98 = vector.multi_reduction <add>, %97, %cst_36 [1] : vector<8x32xf32> to vector<8xf32>
    %99 = vector.shape_cast %98 : vector<8xf32> to vector<8x1xf32>
    %cst_37 = arith.constant 3.200000e+01 : f32
    %100 = vector.broadcast %cst_37 : f32 to vector<8x1xf32>
    %101 = arith.divf %99, %100 : vector<8x1xf32>
    %102 = vector.broadcast %94 : vector<8x1xf32> to vector<8x32xf32>
    %103 = arith.subf %90, %102 : vector<8x32xf32>
    %cst_38 = arith.constant 9.99999974E-6 : f32
    %104 = vector.broadcast %cst_38 : f32 to vector<8x1xf32>
    %105 = arith.addf %101, %104 : vector<8x1xf32>
    %106 = math.rsqrt %105 : vector<8x1xf32>
    %107 = vector.broadcast %106 : vector<8x1xf32> to vector<8x32xf32>
    %108 = arith.mulf %103, %107 : vector<8x32xf32>
    %c0_39 = arith.constant 0 : index
    %c0_40 = arith.constant 0 : index
    %109 = vector.load %arg8[%c0_39, %c0_40] : memref<1x32xf32, #tpu.memory_space<vmem>>, vector<1x32xf32>
    %110 = vector.broadcast %109 : vector<1x32xf32> to vector<8x32xf32>
    %111 = arith.mulf %108, %110 : vector<8x32xf32>
    %c0_41 = arith.constant 0 : index
    %c0_42 = arith.constant 0 : index
    %112 = vector.load %arg9[%c0_41, %c0_42] : memref<1x32xf32, #tpu.memory_space<vmem>>, vector<1x32xf32>
    %113 = vector.broadcast %112 : vector<1x32xf32> to vector<8x32xf32>
    %114 = arith.addf %111, %113 : vector<8x32xf32>
    %c0_43 = arith.constant 0 : index
    %c0_44 = arith.constant 0 : index
    %115 = vector.load %arg10[%c0_43, %c0_44] : memref<32x64xf32, #tpu.memory_space<vmem>>, vector<32x64xf32>
    %cst_45 = arith.constant dense<0.000000e+00> : vector<8x64xf32>
    %116 = tpu.matmul %114, %115, %cst_45 {dimension_numbers = #tpu.dot_dimension_numbers<[1], [0], [0], [1], [0, 0, 1, 1], [], []>} : vector<8x32xf32>, vector<32x64xf32>, vector<8x64xf32> -> vector<8x64xf32>
    %c0_46 = arith.constant 0 : index
    %c0_47 = arith.constant 0 : index
    %117 = vector.load %arg11[%c0_46, %c0_47] : memref<1x64xf32, #tpu.memory_space<vmem>>, vector<1x64xf32>
    %118 = vector.broadcast %117 : vector<1x64xf32> to vector<8x64xf32>
    %119 = arith.addf %116, %118 : vector<8x64xf32>
    %cst_48 = arith.constant 0.000000e+00 : f32
    %120 = vector.broadcast %cst_48 : f32 to vector<8x64xf32>
    %121 = arith.maximumf %119, %120 : vector<8x64xf32>
    %c0_49 = arith.constant 0 : index
    %c0_50 = arith.constant 0 : index
    %122 = vector.load %arg12[%c0_49, %c0_50] : memref<64x32xf32, #tpu.memory_space<vmem>>, vector<64x32xf32>
    %cst_51 = arith.constant dense<0.000000e+00> : vector<8x32xf32>
    %123 = tpu.matmul %121, %122, %cst_51 {dimension_numbers = #tpu.dot_dimension_numbers<[1], [0], [0], [1], [0, 0, 1, 1], [], []>} : vector<8x64xf32>, vector<64x32xf32>, vector<8x32xf32> -> vector<8x32xf32>
    %c0_52 = arith.constant 0 : index
    %c0_53 = arith.constant 0 : index
    %124 = vector.load %arg13[%c0_52, %c0_53] : memref<1x32xf32, #tpu.memory_space<vmem>>, vector<1x32xf32>
    %125 = vector.broadcast %124 : vector<1x32xf32> to vector<8x32xf32>
    %126 = arith.addf %123, %125 : vector<8x32xf32>
    %127 = arith.addf %114, %126 : vector<8x32xf32>
    %cst_54 = arith.constant dense<0.000000e+00> : vector<8xf32>
    %128 = vector.multi_reduction <add>, %127, %cst_54 [1] : vector<8x32xf32> to vector<8xf32>
    %129 = vector.shape_cast %128 : vector<8xf32> to vector<8x1xf32>
    %cst_55 = arith.constant 3.200000e+01 : f32
    %130 = vector.broadcast %cst_55 : f32 to vector<8x1xf32>
    %131 = arith.divf %129, %130 : vector<8x1xf32>
    %132 = vector.broadcast %131 : vector<8x1xf32> to vector<8x32xf32>
    %133 = arith.subf %127, %132 : vector<8x32xf32>
    %134 = arith.mulf %133, %133 : vector<8x32xf32>
    %cst_56 = arith.constant dense<0.000000e+00> : vector<8xf32>
    %135 = vector.multi_reduction <add>, %134, %cst_56 [1] : vector<8x32xf32> to vector<8xf32>
    %136 = vector.shape_cast %135 : vector<8xf32> to vector<8x1xf32>
    %cst_57 = arith.constant 3.200000e+01 : f32
    %137 = vector.broadcast %cst_57 : f32 to vector<8x1xf32>
    %138 = arith.divf %136, %137 : vector<8x1xf32>
    %139 = vector.broadcast %131 : vector<8x1xf32> to vector<8x32xf32>
    %140 = arith.subf %127, %139 : vector<8x32xf32>
    %cst_58 = arith.constant 9.99999974E-6 : f32
    %141 = vector.broadcast %cst_58 : f32 to vector<8x1xf32>
    %142 = arith.addf %138, %141 : vector<8x1xf32>
    %143 = math.rsqrt %142 : vector<8x1xf32>
    %144 = vector.broadcast %143 : vector<8x1xf32> to vector<8x32xf32>
    %145 = arith.mulf %140, %144 : vector<8x32xf32>
    %c0_59 = arith.constant 0 : index
    %c0_60 = arith.constant 0 : index
    %146 = vector.load %arg14[%c0_59, %c0_60] : memref<1x32xf32, #tpu.memory_space<vmem>>, vector<1x32xf32>
    %147 = vector.broadcast %146 : vector<1x32xf32> to vector<8x32xf32>
    %148 = arith.mulf %145, %147 : vector<8x32xf32>
    %c0_61 = arith.constant 0 : index
    %c0_62 = arith.constant 0 : index
    %149 = vector.load %arg15[%c0_61, %c0_62] : memref<1x32xf32, #tpu.memory_space<vmem>>, vector<1x32xf32>
    %150 = vector.broadcast %149 : vector<1x32xf32> to vector<8x32xf32>
    %151 = arith.addf %148, %150 : vector<8x32xf32>
    %c0_63 = arith.constant 0 : index
    %c0_64 = arith.constant 0 : index
    %152 = vector.load %arg16[%c0_63, %c0_64] : memref<8x32xf32, #tpu.memory_space<vmem>>, vector<8x32xf32>
    tpu.vector_store %arg16[%c0_63, %c0_64], %151 {strides = array<i32>} : memref<8x32xf32, #tpu.memory_space<vmem>>, vector<8x32xf32>,
    return
  }
  func.func @transform_0(%arg0: i32) -> (i32, i32) {
    %c0_i32 = arith.constant 0 : i32
    %c0_i32_0 = arith.constant 0 : i32
    return %arg0, %c0_i32 : i32, i32
  }
  func.func @transform_1(%arg0: i32) -> (i32, i32) {
    %c0_i32 = arith.constant 0 : i32
    %c0_i32_0 = arith.constant 0 : i32
    %c0_i32_1 = arith.constant 0 : i32
    return %c0_i32, %c0_i32_0 : i32, i32
  }
  func.func @transform_2(%arg0: i32) -> (i32, i32) {
    %c0_i32 = arith.constant 0 : i32
    %c0_i32_0 = arith.constant 0 : i32
    %c0_i32_1 = arith.constant 0 : i32
    return %c0_i32, %c0_i32_0 : i32, i32
  }
  func.func @transform_3(%arg0: i32) -> (i32, i32) {
    %c0_i32 = arith.constant 0 : i32
    %c0_i32_0 = arith.constant 0 : i32
    %c0_i32_1 = arith.constant 0 : i32
    return %c0_i32, %c0_i32_0 : i32, i32
  }
  func.func @transform_4(%arg0: i32) -> (i32, i32) {
    %c0_i32 = arith.constant 0 : i32
    %c0_i32_0 = arith.constant 0 : i32
    %c0_i32_1 = arith.constant 0 : i32
    return %c0_i32, %c0_i32_0 : i32, i32
  }
  func.func @transform_5(%arg0: i32) -> (i32, i32) {
    %c0_i32 = arith.constant 0 : i32
    %c0_i32_0 = arith.constant 0 : i32
    %c0_i32_1 = arith.constant 0 : i32
    return %c0_i32, %c0_i32_0 : i32, i32
  }
  func.func @transform_6(%arg0: i32) -> (i32, i32) {
    %c0_i32 = arith.constant 0 : i32
    %c0_i32_0 = arith.constant 0 : i32
    %c0_i32_1 = arith.constant 0 : i32
    return %c0_i32, %c0_i32_0 : i32, i32
  }
  func.func @transform_7(%arg0: i32) -> (i32, i32) {
    %c0_i32 = arith.constant 0 : i32
    %c0_i32_0 = arith.constant 0 : i32
    %c0_i32_1 = arith.constant 0 : i32
    return %c0_i32, %c0_i32_0 : i32, i32
  }
  func.func @transform_8(%arg0: i32) -> (i32, i32) {
    %c0_i32 = arith.constant 0 : i32
    %c0_i32_0 = arith.constant 0 : i32
    %c0_i32_1 = arith.constant 0 : i32
    return %c0_i32, %c0_i32_0 : i32, i32
  }
  func.func @transform_9(%arg0: i32) -> (i32, i32) {
    %c0_i32 = arith.constant 0 : i32
    %c0_i32_0 = arith.constant 0 : i32
    %c0_i32_1 = arith.constant 0 : i32
    return %c0_i32, %c0_i32_0 : i32, i32
  }
  func.func @transform_10(%arg0: i32) -> (i32, i32) {
    %c0_i32 = arith.constant 0 : i32
    %c0_i32_0 = arith.constant 0 : i32
    %c0_i32_1 = arith.constant 0 : i32
    return %c0_i32, %c0_i32_0 : i32, i32
  }
  func.func @transform_11(%arg0: i32) -> (i32, i32) {
    %c0_i32 = arith.constant 0 : i32
    %c0_i32_0 = arith.constant 0 : i32
    %c0_i32_1 = arith.constant 0 : i32
    return %c0_i32, %c0_i32_0 : i32, i32
  }
  func.func @transform_12(%arg0: i32) -> (i32, i32) {
    %c0_i32 = arith.constant 0 : i32
    %c0_i32_0 = arith.constant 0 : i32
    %c0_i32_1 = arith.constant 0 : i32
    return %c0_i32, %c0_i32_0 : i32, i32
  }
  func.func @transform_13(%arg0: i32) -> (i32, i32) {
    %c0_i32 = arith.constant 0 : i32
    %c0_i32_0 = arith.constant 0 : i32
    %c0_i32_1 = arith.constant 0 : i32
    return %c0_i32, %c0_i32_0 : i32, i32
  }
  func.func @transform_14(%arg0: i32) -> (i32, i32) {
    %c0_i32 = arith.constant 0 : i32
    %c0_i32_0 = arith.constant 0 : i32
    %c0_i32_1 = arith.constant 0 : i32
    return %c0_i32, %c0_i32_0 : i32, i32
  }
  func.func @transform_15(%arg0: i32) -> (i32, i32) {
    %c0_i32 = arith.constant 0 : i32
    %c0_i32_0 = arith.constant 0 : i32
    return %arg0, %c0_i32 : i32, i32
  }
}

module attributes {stable_mosaic.version = 11 : i64} {
  func.func @_proj_ce_kernel(%arg0: memref<16x32xf32, #tpu.memory_space<vmem>>, %arg1: memref<32x66xf32, #tpu.memory_space<vmem>>, %arg2: memref<1x66xf32, #tpu.memory_space<vmem>>, %arg3: memref<16x5xi32, #tpu.memory_space<vmem>>, %arg4: memref<16x1xf32, #tpu.memory_space<vmem>>, %arg5: memref<1x1xf32, #tpu.memory_space<vmem>>) attributes {dimension_semantics = [], scalar_prefetch = 0 : i64, scratch_operands = 0 : i64, tpu.core_type = #tpu.core_type<tc>} {
    %c0 = arith.constant 0 : index
    %c0_0 = arith.constant 0 : index
    %0 = vector.load %arg0[%c0, %c0_0] : memref<16x32xf32, #tpu.memory_space<vmem>>, vector<16x32xf32>
    %c0_1 = arith.constant 0 : index
    %c0_2 = arith.constant 0 : index
    %1 = vector.load %arg1[%c0_1, %c0_2] : memref<32x66xf32, #tpu.memory_space<vmem>>, vector<32x66xf32>
    %cst = arith.constant dense<0.000000e+00> : vector<16x66xf32>
    %2 = tpu.matmul %0, %1, %cst {dimension_numbers = #tpu.dot_dimension_numbers<[1], [0], [0], [1], [0, 0, 1, 1], [], []>} : vector<16x32xf32>, vector<32x66xf32>, vector<16x66xf32> -> vector<16x66xf32>
    %c0_3 = arith.constant 0 : index
    %c0_4 = arith.constant 0 : index
    %3 = vector.load %arg2[%c0_3, %c0_4] : memref<1x66xf32, #tpu.memory_space<vmem>>, vector<1x66xf32>
    %4 = vector.broadcast %3 : vector<1x66xf32> to vector<16x66xf32>
    %5 = arith.addf %2, %4 : vector<16x66xf32>
    %6 = tpu.iota {dimensions = array<i32: 1>} : vector<16x66xi32>
    %c0_5 = arith.constant 0 : index
    %c0_6 = arith.constant 0 : index
    %7 = vector.load %arg4[%c0_5, %c0_6] : memref<16x1xf32, #tpu.memory_space<vmem>>, vector<16x1xf32>
    %cst_7 = arith.constant 0.000000e+00 : f32
    %8 = vector.broadcast %cst_7 : f32 to vector<1x1xf32>
    %c0_i32 = arith.constant 0 : i32
    %9 = vector.broadcast %c0_i32 : i32 to vector<16x66xi32>
    %10 = arith.cmpi sge, %6, %9 : vector<16x66xi32>
    %c12_i32 = arith.constant 12 : i32
    %11 = vector.broadcast %c12_i32 : i32 to vector<16x66xi32>
    %12 = arith.cmpi slt, %6, %11 : vector<16x66xi32>
    %13 = arith.andi %10, %12 : vector<16x66xi1>
    %cst_8 = arith.constant -1.000000e+30 : f32
    %14 = vector.broadcast %cst_8 : f32 to vector<16x66xf32>
    %15 = arith.select %13, %5, %14 : vector<16x66xi1>, vector<16x66xf32>
    %cst_9 = arith.constant dense<0xFF800000> : vector<16xf32>
    %16 = vector.multi_reduction <maximumf>, %15, %cst_9 [1] : vector<16x66xf32> to vector<16xf32>
    %17 = vector.shape_cast %16 : vector<16xf32> to vector<16x1xf32>
    %18 = vector.broadcast %17 : vector<16x1xf32> to vector<16x66xf32>
    %19 = arith.subf %15, %18 : vector<16x66xf32>
    %20 = math.exp %19 : vector<16x66xf32>
    %cst_10 = arith.constant dense<0.000000e+00> : vector<16xf32>
    %21 = vector.multi_reduction <add>, %20, %cst_10 [1] : vector<16x66xf32> to vector<16xf32>
    %22 = vector.shape_cast %21 : vector<16xf32> to vector<16x1xf32>
    %23 = math.log %22 : vector<16x1xf32>
    %24 = arith.addf %23, %17 : vector<16x1xf32>
    %c0_11 = arith.constant 0 : index
    %c0_12 = arith.constant 0 : index
    %25 = vector.load %arg3[%c0_11, %c0_12] : memref<16x5xi32, #tpu.memory_space<vmem>>, vector<16x1xi32>
    %26 = vector.broadcast %25 : vector<16x1xi32> to vector<16x66xi32>
    %27 = arith.cmpi eq, %6, %26 : vector<16x66xi32>
    %28 = arith.extui %27 : vector<16x66xi1> to vector<16x66xi32>
    %29 = arith.sitofp %28 : vector<16x66xi32> to vector<16x66xf32>
    %30 = arith.mulf %5, %29 : vector<16x66xf32>
    %cst_13 = arith.constant dense<0.000000e+00> : vector<16xf32>
    %31 = vector.multi_reduction <add>, %30, %cst_13 [1] : vector<16x66xf32> to vector<16xf32>
    %32 = vector.shape_cast %31 : vector<16xf32> to vector<16x1xf32>
    %33 = arith.subf %24, %32 : vector<16x1xf32>
    %34 = arith.mulf %33, %7 : vector<16x1xf32>
    %cst_14 = arith.constant dense<0.000000e+00> : vector<16xf32>
    %35 = vector.multi_reduction <add>, %34, %cst_14 [1] : vector<16x1xf32> to vector<16xf32>
    %36 = vector.shape_cast %35 : vector<16xf32> to vector<16x1xf32>
    %cst_15 = arith.constant dense<0.000000e+00> : vector<1xf32>
    %37 = vector.multi_reduction <add>, %36, %cst_15 [0] : vector<16x1xf32> to vector<1xf32>
    %38 = vector.shape_cast %37 : vector<1xf32> to vector<1x1xf32>
    %39 = arith.addf %8, %38 : vector<1x1xf32>
    %c12_i32_16 = arith.constant 12 : i32
    %40 = vector.broadcast %c12_i32_16 : i32 to vector<16x66xi32>
    %41 = arith.cmpi sge, %6, %40 : vector<16x66xi32>
    %c20_i32 = arith.constant 20 : i32
    %42 = vector.broadcast %c20_i32 : i32 to vector<16x66xi32>
    %43 = arith.cmpi slt, %6, %42 : vector<16x66xi32>
    %44 = arith.andi %41, %43 : vector<16x66xi1>
    %cst_17 = arith.constant -1.000000e+30 : f32
    %45 = vector.broadcast %cst_17 : f32 to vector<16x66xf32>
    %46 = arith.select %44, %5, %45 : vector<16x66xi1>, vector<16x66xf32>
    %cst_18 = arith.constant dense<0xFF800000> : vector<16xf32>
    %47 = vector.multi_reduction <maximumf>, %46, %cst_18 [1] : vector<16x66xf32> to vector<16xf32>
    %48 = vector.shape_cast %47 : vector<16xf32> to vector<16x1xf32>
    %49 = vector.broadcast %48 : vector<16x1xf32> to vector<16x66xf32>
    %50 = arith.subf %46, %49 : vector<16x66xf32>
    %51 = math.exp %50 : vector<16x66xf32>
    %cst_19 = arith.constant dense<0.000000e+00> : vector<16xf32>
    %52 = vector.multi_reduction <add>, %51, %cst_19 [1] : vector<16x66xf32> to vector<16xf32>
    %53 = vector.shape_cast %52 : vector<16xf32> to vector<16x1xf32>
    %54 = math.log %53 : vector<16x1xf32>
    %55 = arith.addf %54, %48 : vector<16x1xf32>
    %c0_20 = arith.constant 0 : index
    %c1 = arith.constant 1 : index
    %56 = vector.load %arg3[%c0_20, %c1] : memref<16x5xi32, #tpu.memory_space<vmem>>, vector<16x1xi32>
    %57 = vector.broadcast %56 : vector<16x1xi32> to vector<16x66xi32>
    %58 = arith.cmpi eq, %6, %57 : vector<16x66xi32>
    %59 = arith.extui %58 : vector<16x66xi1> to vector<16x66xi32>
    %60 = arith.sitofp %59 : vector<16x66xi32> to vector<16x66xf32>
    %61 = arith.mulf %5, %60 : vector<16x66xf32>
    %cst_21 = arith.constant dense<0.000000e+00> : vector<16xf32>
    %62 = vector.multi_reduction <add>, %61, %cst_21 [1] : vector<16x66xf32> to vector<16xf32>
    %63 = vector.shape_cast %62 : vector<16xf32> to vector<16x1xf32>
    %64 = arith.subf %55, %63 : vector<16x1xf32>
    %65 = arith.mulf %64, %7 : vector<16x1xf32>
    %cst_22 = arith.constant dense<0.000000e+00> : vector<16xf32>
    %66 = vector.multi_reduction <add>, %65, %cst_22 [1] : vector<16x1xf32> to vector<16xf32>
    %67 = vector.shape_cast %66 : vector<16xf32> to vector<16x1xf32>
    %cst_23 = arith.constant dense<0.000000e+00> : vector<1xf32>
    %68 = vector.multi_reduction <add>, %67, %cst_23 [0] : vector<16x1xf32> to vector<1xf32>
    %69 = vector.shape_cast %68 : vector<1xf32> to vector<1x1xf32>
    %70 = arith.addf %39, %69 : vector<1x1xf32>
    %c20_i32_24 = arith.constant 20 : i32
    %71 = vector.broadcast %c20_i32_24 : i32 to vector<16x66xi32>
    %72 = arith.cmpi sge, %6, %71 : vector<16x66xi32>
    %c36_i32 = arith.constant 36 : i32
    %73 = vector.broadcast %c36_i32 : i32 to vector<16x66xi32>
    %74 = arith.cmpi slt, %6, %73 : vector<16x66xi32>
    %75 = arith.andi %72, %74 : vector<16x66xi1>
    %cst_25 = arith.constant -1.000000e+30 : f32
    %76 = vector.broadcast %cst_25 : f32 to vector<16x66xf32>
    %77 = arith.select %75, %5, %76 : vector<16x66xi1>, vector<16x66xf32>
    %cst_26 = arith.constant dense<0xFF800000> : vector<16xf32>
    %78 = vector.multi_reduction <maximumf>, %77, %cst_26 [1] : vector<16x66xf32> to vector<16xf32>
    %79 = vector.shape_cast %78 : vector<16xf32> to vector<16x1xf32>
    %80 = vector.broadcast %79 : vector<16x1xf32> to vector<16x66xf32>
    %81 = arith.subf %77, %80 : vector<16x66xf32>
    %82 = math.exp %81 : vector<16x66xf32>
    %cst_27 = arith.constant dense<0.000000e+00> : vector<16xf32>
    %83 = vector.multi_reduction <add>, %82, %cst_27 [1] : vector<16x66xf32> to vector<16xf32>
    %84 = vector.shape_cast %83 : vector<16xf32> to vector<16x1xf32>
    %85 = math.log %84 : vector<16x1xf32>
    %86 = arith.addf %85, %79 : vector<16x1xf32>
    %c0_28 = arith.constant 0 : index
    %c2 = arith.constant 2 : index
    %87 = vector.load %arg3[%c0_28, %c2] : memref<16x5xi32, #tpu.memory_space<vmem>>, vector<16x1xi32>
    %88 = vector.broadcast %87 : vector<16x1xi32> to vector<16x66xi32>
    %89 = arith.cmpi eq, %6, %88 : vector<16x66xi32>
    %90 = arith.extui %89 : vector<16x66xi1> to vector<16x66xi32>
    %91 = arith.sitofp %90 : vector<16x66xi32> to vector<16x66xf32>
    %92 = arith.mulf %5, %91 : vector<16x66xf32>
    %cst_29 = arith.constant dense<0.000000e+00> : vector<16xf32>
    %93 = vector.multi_reduction <add>, %92, %cst_29 [1] : vector<16x66xf32> to vector<16xf32>
    %94 = vector.shape_cast %93 : vector<16xf32> to vector<16x1xf32>
    %95 = arith.subf %86, %94 : vector<16x1xf32>
    %96 = arith.mulf %95, %7 : vector<16x1xf32>
    %cst_30 = arith.constant dense<0.000000e+00> : vector<16xf32>
    %97 = vector.multi_reduction <add>, %96, %cst_30 [1] : vector<16x1xf32> to vector<16xf32>
    %98 = vector.shape_cast %97 : vector<16xf32> to vector<16x1xf32>
    %cst_31 = arith.constant dense<0.000000e+00> : vector<1xf32>
    %99 = vector.multi_reduction <add>, %98, %cst_31 [0] : vector<16x1xf32> to vector<1xf32>
    %100 = vector.shape_cast %99 : vector<1xf32> to vector<1x1xf32>
    %101 = arith.addf %70, %100 : vector<1x1xf32>
    %c36_i32_32 = arith.constant 36 : i32
    %102 = vector.broadcast %c36_i32_32 : i32 to vector<16x66xi32>
    %103 = arith.cmpi sge, %6, %102 : vector<16x66xi32>
    %c56_i32 = arith.constant 56 : i32
    %104 = vector.broadcast %c56_i32 : i32 to vector<16x66xi32>
    %105 = arith.cmpi slt, %6, %104 : vector<16x66xi32>
    %106 = arith.andi %103, %105 : vector<16x66xi1>
    %cst_33 = arith.constant -1.000000e+30 : f32
    %107 = vector.broadcast %cst_33 : f32 to vector<16x66xf32>
    %108 = arith.select %106, %5, %107 : vector<16x66xi1>, vector<16x66xf32>
    %cst_34 = arith.constant dense<0xFF800000> : vector<16xf32>
    %109 = vector.multi_reduction <maximumf>, %108, %cst_34 [1] : vector<16x66xf32> to vector<16xf32>
    %110 = vector.shape_cast %109 : vector<16xf32> to vector<16x1xf32>
    %111 = vector.broadcast %110 : vector<16x1xf32> to vector<16x66xf32>
    %112 = arith.subf %108, %111 : vector<16x66xf32>
    %113 = math.exp %112 : vector<16x66xf32>
    %cst_35 = arith.constant dense<0.000000e+00> : vector<16xf32>
    %114 = vector.multi_reduction <add>, %113, %cst_35 [1] : vector<16x66xf32> to vector<16xf32>
    %115 = vector.shape_cast %114 : vector<16xf32> to vector<16x1xf32>
    %116 = math.log %115 : vector<16x1xf32>
    %117 = arith.addf %116, %110 : vector<16x1xf32>
    %c0_36 = arith.constant 0 : index
    %c3 = arith.constant 3 : index
    %118 = vector.load %arg3[%c0_36, %c3] : memref<16x5xi32, #tpu.memory_space<vmem>>, vector<16x1xi32>
    %119 = vector.broadcast %118 : vector<16x1xi32> to vector<16x66xi32>
    %120 = arith.cmpi eq, %6, %119 : vector<16x66xi32>
    %121 = arith.extui %120 : vector<16x66xi1> to vector<16x66xi32>
    %122 = arith.sitofp %121 : vector<16x66xi32> to vector<16x66xf32>
    %123 = arith.mulf %5, %122 : vector<16x66xf32>
    %cst_37 = arith.constant dense<0.000000e+00> : vector<16xf32>
    %124 = vector.multi_reduction <add>, %123, %cst_37 [1] : vector<16x66xf32> to vector<16xf32>
    %125 = vector.shape_cast %124 : vector<16xf32> to vector<16x1xf32>
    %126 = arith.subf %117, %125 : vector<16x1xf32>
    %127 = arith.mulf %126, %7 : vector<16x1xf32>
    %cst_38 = arith.constant dense<0.000000e+00> : vector<16xf32>
    %128 = vector.multi_reduction <add>, %127, %cst_38 [1] : vector<16x1xf32> to vector<16xf32>
    %129 = vector.shape_cast %128 : vector<16xf32> to vector<16x1xf32>
    %cst_39 = arith.constant dense<0.000000e+00> : vector<1xf32>
    %130 = vector.multi_reduction <add>, %129, %cst_39 [0] : vector<16x1xf32> to vector<1xf32>
    %131 = vector.shape_cast %130 : vector<1xf32> to vector<1x1xf32>
    %132 = arith.addf %101, %131 : vector<1x1xf32>
    %c56_i32_40 = arith.constant 56 : i32
    %133 = vector.broadcast %c56_i32_40 : i32 to vector<16x66xi32>
    %134 = arith.cmpi sge, %6, %133 : vector<16x66xi32>
    %c66_i32 = arith.constant 66 : i32
    %135 = vector.broadcast %c66_i32 : i32 to vector<16x66xi32>
    %136 = arith.cmpi slt, %6, %135 : vector<16x66xi32>
    %137 = arith.andi %134, %136 : vector<16x66xi1>
    %cst_41 = arith.constant -1.000000e+30 : f32
    %138 = vector.broadcast %cst_41 : f32 to vector<16x66xf32>
    %139 = arith.select %137, %5, %138 : vector<16x66xi1>, vector<16x66xf32>
    %cst_42 = arith.constant dense<0xFF800000> : vector<16xf32>
    %140 = vector.multi_reduction <maximumf>, %139, %cst_42 [1] : vector<16x66xf32> to vector<16xf32>
    %141 = vector.shape_cast %140 : vector<16xf32> to vector<16x1xf32>
    %142 = vector.broadcast %141 : vector<16x1xf32> to vector<16x66xf32>
    %143 = arith.subf %139, %142 : vector<16x66xf32>
    %144 = math.exp %143 : vector<16x66xf32>
    %cst_43 = arith.constant dense<0.000000e+00> : vector<16xf32>
    %145 = vector.multi_reduction <add>, %144, %cst_43 [1] : vector<16x66xf32> to vector<16xf32>
    %146 = vector.shape_cast %145 : vector<16xf32> to vector<16x1xf32>
    %147 = math.log %146 : vector<16x1xf32>
    %148 = arith.addf %147, %141 : vector<16x1xf32>
    %c0_44 = arith.constant 0 : index
    %c4 = arith.constant 4 : index
    %149 = vector.load %arg3[%c0_44, %c4] : memref<16x5xi32, #tpu.memory_space<vmem>>, vector<16x1xi32>
    %150 = vector.broadcast %149 : vector<16x1xi32> to vector<16x66xi32>
    %151 = arith.cmpi eq, %6, %150 : vector<16x66xi32>
    %152 = arith.extui %151 : vector<16x66xi1> to vector<16x66xi32>
    %153 = arith.sitofp %152 : vector<16x66xi32> to vector<16x66xf32>
    %154 = arith.mulf %5, %153 : vector<16x66xf32>
    %cst_45 = arith.constant dense<0.000000e+00> : vector<16xf32>
    %155 = vector.multi_reduction <add>, %154, %cst_45 [1] : vector<16x66xf32> to vector<16xf32>
    %156 = vector.shape_cast %155 : vector<16xf32> to vector<16x1xf32>
    %157 = arith.subf %148, %156 : vector<16x1xf32>
    %158 = arith.mulf %157, %7 : vector<16x1xf32>
    %cst_46 = arith.constant dense<0.000000e+00> : vector<16xf32>
    %159 = vector.multi_reduction <add>, %158, %cst_46 [1] : vector<16x1xf32> to vector<16xf32>
    %160 = vector.shape_cast %159 : vector<16xf32> to vector<16x1xf32>
    %cst_47 = arith.constant dense<0.000000e+00> : vector<1xf32>
    %161 = vector.multi_reduction <add>, %160, %cst_47 [0] : vector<16x1xf32> to vector<1xf32>
    %162 = vector.shape_cast %161 : vector<1xf32> to vector<1x1xf32>
    %163 = arith.addf %132, %162 : vector<1x1xf32>
    %cst_48 = arith.constant dense<0.000000e+00> : vector<16xf32>
    %164 = vector.multi_reduction <add>, %7, %cst_48 [1] : vector<16x1xf32> to vector<16xf32>
    %165 = vector.shape_cast %164 : vector<16xf32> to vector<16x1xf32>
    %cst_49 = arith.constant dense<0.000000e+00> : vector<1xf32>
    %166 = vector.multi_reduction <add>, %165, %cst_49 [0] : vector<16x1xf32> to vector<1xf32>
    %167 = vector.shape_cast %166 : vector<1xf32> to vector<1x1xf32>
    %168 = arith.divf %163, %167 : vector<1x1xf32>
    %c0_50 = arith.constant 0 : index
    %c0_51 = arith.constant 0 : index
    %169 = vector.load %arg5[%c0_50, %c0_51] : memref<1x1xf32, #tpu.memory_space<vmem>>, vector<1x1xf32>
    tpu.vector_store %arg5[%c0_50, %c0_51], %168 {strides = array<i32>} : memref<1x1xf32, #tpu.memory_space<vmem>>, vector<1x1xf32>,
    return
  }
}

</mosaic_0001>

<bundles_post_ra>
// kernel: mem_transformer_forward.4
= control target key start
LH: loop header
LB: loop body
LE: loop exit
PB: predicated region body
PF: predicated region fallthrough
CT: control target
= control target key end

     0   :  { %v171_v0 = vmov 1   ;;  %v172_v1 = vmov 0   ;;  %v173_v3 = vmov 2   ;;  %v174_v5 = vmov 3   ;;  %s231_s0 = inlined_call_operand.vmem [shape: s32[16,5], index: 0, kind: input, shape index: {}]   ;;  %s232_s1 = inlined_call_operand.vmem [shape: f32[66,32], index: 1, kind: input, shape index: {}]   ;;  %s233_s2 = inlined_call_operand.vmem [shape: f32[16,32], index: 2, kind: output, shape index: {}]  }
   0x1   :  { %164 = vset.pattern.permute.xlu1 %v171_v0  ;;  %163 = vset.pattern.permute.xlu0 %v172_v1  ;;  %v13_v2 = vld [vmem:[%s231_s0] sm:$0xff]  ;;  %v14_v4 = vld [vmem:[%s231_s0 + $0x8] sm:$0xff]  ;;  %v175_v6 = vmov 4   ;;  %vm101_vm0 = vcmask 1041408   ;;  %v92_v8 = vld [vmem:[%s232_s1 + $0x38] sm:$0xff]  ;;  %v11_v17 = vlaneseq  ;;  %v176_v24 = vmov 0.0  }
   0x2   :  { %30 = vperm.xlu1 %164, %v13_v2   ;;  %16 = vperm.xlu0 %163, %v13_v2   ;;  %v93_v7 = vld [vmem:[%s232_s1 + $0x40] sm:$0x3]  ;;  %v91_v9 = vld [vmem:[%s232_s1 + $0x30] sm:$0xff]  ;;  %v90_v10 = vld [vmem:[%s232_s1 + $0x28] sm:$0xff]  ;;  %vm94_vm10 = vcmask 539648   ;;  %vm128_vm12 = vcmask 261120  }
   0x3   :  { %165 = vset.pattern.permute.xlu2 %v173_v3  ;;  %145 = vmatpush.msk.msra.mxu0 %vm101_vm0, %v93_v7  ;;  %v89_v11 = vld [vmem:[%s232_s1 + $0x20] sm:$0xff]  ;;  %v88_v12 = vld [vmem:[%s232_s1 + $0x18] sm:$0xff]  ;;  %v87_v13 = vld [vmem:[%s232_s1 + $0x10] sm:$0xff]  ;;  %v12_v20 = vand.u32 127, %v11_v17 }
   0x4   :  { %44 = vperm.xlu2 %165, %v13_v2   ;;  %148 = vmatpush.msk.msra.mxu1 %vm101_vm0, %v93_v7  ;;  %v86_v14 = vld [vmem:[%s232_s1 + $0x8] sm:$0xff]  ;;  %v85_v15 = vld [vmem:[%s232_s1] sm:$0xff] }
   0x5   :  { %113 = vmatpush.msra.mxu0 %v92_v8 }
   0x6   :  { %149 = vmatpush.msra.mxu1 %v92_v8 }
   0x7   :  { %114 = vmatpush.msra.mxu0 %v91_v9 }
   0x8   :  { %150 = vmatpush.msra.mxu1 %v91_v9 }
   0x9   :  { %115 = vmatpush.msra.mxu0 %v90_v10 }
   0xa   :  { %33 = vperm.xlu1 %164, %v14_v4   ;;  %19 = vperm.xlu0 %163, %v14_v4  }
   0xb   :  { %151 = vmatpush.msra.mxu1 %v90_v10  ;;  %116 = vmatpush.msra.mxu0 %v89_v11 }
   0xc   :  { %47 = vperm.xlu2 %165, %v14_v4  }
   0xd   :  { %152 = vmatpush.msra.mxu1 %v89_v11  ;;  %117 = vmatpush.msra.mxu0 %v88_v12 }
   0xf   :  { %153 = vmatpush.msra.mxu1 %v88_v12  ;;  %118 = vmatpush.msra.mxu0 %v87_v13 }
  0x11   :  { %154 = vmatpush.msra.mxu1 %v87_v13  ;;  %119 = vmatpush.msra.mxu0 %v86_v14 }
  0x12   :  { %167 = vset.pattern.permute.xlu1 %v174_v5  ;;  %166 = vset.pattern.permute.xlu0 %v174_v5 }
  0x13   :  { %61 = vperm.xlu1 %167, %v14_v4   ;;  %58 = vperm.xlu0 %166, %v13_v2  }
  0x14   :  { %168 = vset.pattern.permute.xlu2 %v175_v6  ;;  %155 = vmatpush.msra.mxu1 %v86_v14 }
  0x15   :  { %72 = vperm.xlu2 %168, %v13_v2   ;;  %120 = vmatpush.msra.mxu0 %v85_v15 }
  0x16   :  { %156 = vmatpush.msra.mxu1 %v85_v15 }
  0x1b   :  { %169 = vset.pattern.permute.xlu1 %v175_v6  ;;  %170 = vset.pattern.permute.xlu0 %v175_v6 }
  0x1c   :  { %75 = vperm.xlu1 %169, %v14_v4  }
  0x5e   :  { %v45_v16 = vpop.permute.xlu2 %44 }
  0x5f   :  { %vm49_vm3 = vcmp.eq.s32.totalorder %v12_v20, %v45_v16 }
  0x60   :  { %v139_v29 = vsel %vm49_vm3, 1.0, %v176_v24 }
  0x66   :  { %v48_v21 = vpop.permute.xlu2 %47 }
  0x67   :  { %vm50_vm8 = vcmp.eq.s32.totalorder %v12_v20, %v48_v21 }
  0x68   :  { %v140_v39 = vsel %vm50_vm8, 1.0, %v176_v24 }
  0x6f   :  { %v73_v27 = vpop.permute.xlu2 %72 }
  0x70   :  { %vm77_vm6 = vcmp.eq.s32.totalorder %v12_v20, %v73_v27 }
  0x71   :  { %v143_v36 = vsel %vm77_vm6, 1.0, %v176_v24 }
  0x74   :  { %v31_v18 = vpop.permute.xlu1 %30  ;;  %v17_v19 = vpop.permute.xlu0 %16 }
  0x75   :  { %vm35_vm1 = vcmp.eq.s32.totalorder %v12_v20, %v31_v18  ;;  %vm21_vm2 = vcmp.eq.s32.totalorder %v12_v20, %v17_v19 }
  0x76   :  { %v137_v25 = vsel %vm35_vm1, 1.0, %v176_v24  ;;  %v135_v26 = vsel %vm21_vm2, 1.0, %v176_v24 }
  0x77   :  { %v41_v28 = vadd.f32 %v137_v25, %v135_v26 }
  0x79   :  { %v55_v32 = vadd.f32 %v139_v29, %v41_v28 }
  0x7c   :  { %v34_v22 = vpop.permute.xlu1 %33  ;;  %v20_v23 = vpop.permute.xlu0 %19 }
  0x7d   :  { %vm36_vm4 = vcmp.eq.s32.totalorder %v12_v20, %v34_v22  ;;  %vm22_vm5 = vcmp.eq.s32.totalorder %v12_v20, %v20_v23 }
  0x7e   :  { %v138_v33 = vsel %vm36_vm4, 1.0, %v176_v24  ;;  %v136_v34 = vsel %vm22_vm5, 1.0, %v176_v24 }
  0x7f   :  { %v42_v38 = vadd.f32 %v138_v33, %v136_v34 }
  0x81   :  { %v56_v42 = vadd.f32 %v140_v39, %v42_v38 }
  0x85   :  { %v62_v30 = vpop.permute.xlu1 %61  ;;  %v59_v31 = vpop.permute.xlu0 %58 }
  0x86   :  { %vm63_vm7 = vcmp.eq.s32.totalorder %v12_v20, %v59_v31  ;;  %vm64_vm9 = vcmp.eq.s32.totalorder %v12_v20, %v62_v30 }
  0x87   :  { %v141_v35 = vsel %vm63_vm7, 1.0, %v176_v24  ;;  %v142_v41 = vsel %vm64_vm9, 1.0, %v176_v24 }
  0x88   :  { %v69_v37 = vadd.f32 %v141_v35, %v55_v32  ;;  %v70_v44 = vadd.f32 %v142_v41, %v56_v42 }
  0x8a   :  { %v83_v40 = vadd.f32 %v143_v36, %v69_v37 }
  0x8c   :  { %146 = vmatmul.msk.f32.vlgmr.msra.gmra.mxu0 %vm94_vm10, %v83_v40 }
  0x8e   :  { %v76_v43 = vpop.permute.xlu1 %75 }
  0x8f   :  { %vm78_vm11 = vcmp.eq.s32.totalorder %v12_v20, %v76_v43 }
  0x90   :  { %v144_v45 = vsel %vm78_vm11, 1.0, %v176_v24 }
  0x91   :  { %v84_v46 = vadd.f32 %v144_v45, %v70_v44 }
  0x93   :  { %147 = vmatmul.msk.f32.vlgmr.msra.gmra.mxu1 %vm94_vm10, %v84_v46 }
 0x109   :  { %v122_v47 = vpop.f32.mrf.mxu0 }
 0x10a   :  { %129 = vst.msk [vmem:[%s233_s2] sm:$0xff] %vm128_vm12, %v122_v47 }
 0x110   :  { %v125_v48 = vpop.f32.mrf.mxu1 }
 0x111   :  { %130 = vst.msk [vmem:[%s233_s2 + $0x8] sm:$0xff] %vm128_vm12, %v125_v48 }

// kernel: mem_transformer_forward.7
= control target key start
LH: loop header
LB: loop body
LE: loop exit
PB: predicated region body
PF: predicated region fallthrough
CT: control target
= control target key end

     0   :  { %v539_v2 = vmov 1   ;;  %v540_v5 = vmov 0   ;;  %s877_s0 = inlined_call_operand.vmem [shape: f32[16,32], index: 0, kind: input, shape index: {}]   ;;  %s878_s1 = inlined_call_operand.vmem [shape: f32[32,66], index: 1, kind: input, shape index: {}]   ;;  %s879_s2 = inlined_call_operand.vmem [shape: f32[1,66], index: 2, kind: input, shape index: {}]   ;;  %s880_s3 = inlined_call_operand.vmem [shape: s32[16,5], index: 3, kind: input, shape index: {}]   ;;  %s881_s4 = inlined_call_operand.vmem [shape: f32[16,1], index: 4, kind: input, shape index: {}]   ;;  %s882_s5 = inlined_call_operand.hbm [shape: f32[1,1], index: 5, kind: output, shape index: {}]  }
   0x1   :  { %v26_v0 = vld [vmem:[%s878_s1 + $0x18] sm:$0xff]  ;;  %v25_v1 = vld [vmem:[%s878_s1 + $0x10] sm:$0xff]  ;;  %462 = vset.pattern.permute.xlu1 %v539_v2  ;;  %v585_v3 = vld [vmem:[%s880_s3] sm:$0xff]  ;;  %461 = vset.pattern.permute.xlu2 %v540_v5 }
   0x2   :  { %50 = vmatpush.msra.mxu0 %v26_v0  ;;  %v24_v4 = vld [vmem:[%s878_s1 + $0x8] sm:$0xff]  ;;  %450 = vmatpush.msra.mxu1 %v26_v0 }
   0x3   :  { %164 = vperm.xlu1 %462, %v585_v3   ;;  %v594_v6 = vld [vmem:[%s880_s3 + $0x8] sm:$0xff] }
   0x4   :  { %51 = vmatpush.msra.mxu0 %v25_v1 }
   0x5   :  { %10 = vsyncpa [#allocation3], 0  ;;  %v23_v7 = vld [vmem:[%s878_s1] sm:$0xff]  ;;  %451 = vmatpush.msra.mxu1 %v25_v1  ;;  %463 = vset.pattern.permute.xlu0 %v539_v2  ;;  %vm31_vm0 = vcmask 261120   ;;  %v22_v9 = vld [vmem:[%s877_s0 + $0x8] sm:$0xff]  ;;  %v541_v10 = vmov 3   ;;  %v61_v12 = vlaneseq }
   0x6   :  { %52 = vmatpush.msra.mxu0 %v24_v4  ;;  %v21_v8 = vld [vmem:[%s877_s0] sm:$0xff]  ;;  %98 = vperm.xlu2 %461, %v585_v3   ;;  %v542_v11 = vmov 2   ;;  %vm70_vm8 = vcmask 539648   ;;  %v543_v34 = vmov 4   ;;  %v544_v43 = vmov 0.0   ;;  %s429_s14 = sshll.u32 %s882_s5, 4  ;;  %s430_s14 = int_to_ptr.hbm [resolvable:$true] %s429_s14 }
   0x7   :  { %452 = vmatpush.msra.mxu1 %v24_v4  ;;  %167 = vperm.xlu0 %463, %v594_v6   ;;  %v611_v13 = vand.u32 127, %v61_v12  ;;  %v470_v14 = vld [vmem:[%s879_s2] ss:$0 sm:$0xff] }
   0x8   :  { %53 = vmatpush.msra.mxu0 %v23_v7 }
   0x9   :  { %438 = vmatmul.msk.f32.vlgmr.msra.gmra.mxu0 %vm31_vm0, %v21_v8  ;;  %453 = vmatpush.msra.mxu1 %v23_v7  ;;  %vm264_vm1 = vcmp.ge.s32.totalorder %v611_v13, 36  ;;  %vm265_vm2 = vcmp.lt.s32.totalorder %v611_v13, 56  ;;  %vm134_vm3 = vcmp.ge.s32.totalorder %v611_v13, 12  ;;  %vm135_vm4 = vcmp.lt.s32.totalorder %v611_v13, 20 }
   0xa   :  { %439 = vmatmul.msk.f32.vlgmr.msra.gmra.mxu1 %vm31_vm0, %v22_v9  ;;  %vm620_vm5 = vmand %vm264_vm1, %vm265_vm2  ;;  %vm66_vm7 = vcmp.lt.s32.totalorder %v611_v13, 12  ;;  %vm199_vm9 = vcmp.ge.s32.totalorder %v611_v13, 20  ;;  %vm200_vm10 = vcmp.lt.s32.totalorder %v611_v13, 36  ;;  %vm329_vm12 = vcmp.ge.s32.totalorder %v611_v13, 56 }
   0xb   :  { %466 = vset.pattern.permute.xlu1 %v541_v10  ;;  %vm624_vm6 = vmand %vm134_vm3, %vm135_vm4  ;;  %vm330_vm13 = vcmp.lt.s32.totalorder %v611_v13, 66 }
   0xc   :  { %294 = vperm.xlu1 %466, %v585_v3   ;;  %vm656_vm11 = vmand %vm199_vm9, %vm200_vm10  ;;  %vm123_vm10 = vcmask 7168  }
   0xd   :  { %vm683_vm14 = vmand %vm329_vm12, %vm330_vm13 }
   0xe   :  { %101 = vperm.xlu2 %461, %v594_v6  }
   0xf   :  { %465 = vset.pattern.permute.xlu0 %v542_v11 }
  0x14   :  { %297 = vperm.xlu1 %466, %v594_v6  }
  0x16   :  { %464 = vset.pattern.permute.xlu2 %v542_v11 }
  0x17   :  { %229 = vperm.xlu2 %464, %v585_v3  }
  0x1c   :  { %468 = vset.pattern.permute.xlu1 %v543_v34 }
  0x1f   :  { %467 = vset.pattern.permute.xlu2 %v543_v34 }
  0x60   :  { %v99_v28 = vpop.permute.xlu2 %98 }
  0x61   :  { %vm103_vm2 = vcmp.eq.s32.totalorder %v611_v13, %v99_v28 }
  0x62   :  { %v440_v58 = vsel %vm103_vm2, 1.0, %v544_v43 }
  0x68   :  { %v102_v37 = vpop.permute.xlu2 %101 }
  0x69   :  { %vm104_vm15 = vcmp.eq.s32.totalorder %v611_v13, %v102_v37 }
  0x6a   :  { %v441_v44 = vsel %vm104_vm15, 1.0, %v544_v43 }
  0x71   :  { %v736_v62 = vpop.permute.xlu2 %229 }
  0x72   :  { %vm234_vm4 = vcmp.eq.s32.totalorder %v611_v13, %v736_v62 }
  0x75   :  { %v165_v48 = vpop.permute.xlu1 %164 }
  0x76   :  { %vm169_vm0 = vcmp.eq.s32.totalorder %v611_v13, %v165_v48 }
  0x77   :  { %v442_v52 = vsel %vm169_vm0, 1.0, %v544_v43 }
  0x79   :  { %v168_v46 = vpop.permute.xlu0 %167 }
  0x7a   :  { %vm170_vm1 = vcmp.eq.s32.totalorder %v611_v13, %v168_v46 }
  0x7b   :  { %v443_v53 = vsel %vm170_vm1, 1.0, %v544_v43 }
  0x7e   :  { %v734_v61 = vpop.permute.xlu1 %294 }
  0x86   :  { %v55_v16 = vpop.f32.mrf.mxu0  ;;  %v298_v63 = vpop.permute.xlu1 %297 }
  0x87   :  { %v629_v18 = vadd.f32 %v470_v14, %v55_v16  ;;  %v58_v19 = vpop.f32.mrf.mxu1  ;;  %vm300_vm3 = vcmp.eq.s32.totalorder %v611_v13, %v298_v63 }
  0x88   :  { %v648_v23 = vadd.f32 %v470_v14, %v58_v19  ;;  %v447_v48 = vsel %vm300_vm3, 1.0, %v544_v43 }
  0x89   :  { %v636_v20 = vsel %vm620_vm5, %v629_v18, -1e+30  ;;  %v641_v21 = vsel %vm624_vm6, %v629_v18, -1e+30  ;;  %v646_v22 = vsel %vm66_vm7, %v629_v18, -1e+30  ;;  %v175_v54 = vmul.f32 %v442_v52, %v629_v18 }
  0x8a   :  { %v269_v24 = vsel %vm70_vm8, %v636_v20, -inf  ;;  %v139_v25 = vsel %vm70_vm8, %v641_v21, -inf  ;;  %v71_v26 = vsel %vm70_vm8, %v646_v22, -inf  ;;  %v663_v29 = vsel %vm620_vm5, %v648_v23, -1e+30 }
  0x8b   :  { %270 = vmax.xlane.f32.xlu1 %v269_v24  ;;  %140 = vmax.xlane.f32.xlu2 %v139_v25  ;;  %v668_v30 = vsel %vm66_vm7, %v648_v23, -1e+30  ;;  %v673_v31 = vsel %vm656_vm11, %v629_v18, -1e+30  ;;  %v272_v32 = vsel %vm70_vm8, %v663_v29, -inf  ;;  %v110_v47 = vmul.f32 %v441_v44, %v648_v23 }
  0x8c   :  { %72 = vmax.xlane.f32.xlu0 %v71_v26  ;;  %v74_v33 = vsel %vm70_vm8, %v668_v30, -inf  ;;  %v204_v35 = vsel %vm70_vm8, %v673_v31, -inf  ;;  %v690_v38 = vsel %vm683_vm14, %v648_v23, -1e+30  ;;  %v695_v39 = vsel %vm656_vm11, %v648_v23, -1e+30 }
  0x8d   :  { %v701_v40 = vsel %vm624_vm6, %v648_v23, -1e+30  ;;  %v337_v41 = vsel %vm70_vm8, %v690_v38, -inf  ;;  %v207_v42 = vsel %vm70_vm8, %v695_v39, -inf  ;;  %v714_v49 = vsel %vm683_vm14, %v629_v18, -1e+30 }
  0x8e   :  { %v142_v45 = vsel %vm70_vm8, %v701_v40, -inf  ;;  %v114_v50 = vsel %vm70_vm8, %v110_v47, 0.0  ;;  %v334_v51 = vsel %vm70_vm8, %v714_v49, -inf  ;;  %v176_v55 = vmul.f32 %v443_v53, %v648_v23 }
  0x8f   :  { %v177_v56 = vsel %vm70_vm8, %v175_v54, 0.0  ;;  %v109_v59 = vmul.f32 %v440_v58, %v629_v18  ;;  %v444_v52 = vsel %vm234_vm4, 1.0, %v544_v43  ;;  %v306_v54 = vmul.f32 %v447_v48, %v648_v23 }
  0x90   :  { %v180_v57 = vsel %vm70_vm8, %v176_v55, 0.0  ;;  %v240_v55 = vmul.f32 %v444_v52, %v629_v18  ;;  %vm299_vm5 = vcmp.eq.s32.totalorder %v611_v13, %v734_v61  ;;  %vm420_vm14 = vcmask 0  }
  0x91   :  { %v111_v60 = vsel %vm70_vm8, %v109_v59, 0.0  ;;  %v446_v59 = vsel %vm299_vm5, 1.0, %v544_v43 }
  0x93   :  { %273 = vmax.xlane.f32.xlu1 %v272_v32  ;;  %205 = vmax.xlane.f32.xlu2 %v204_v35 }
  0x94   :  { %75 = vmax.xlane.f32.xlu0 %v74_v33 }
  0x9b   :  { %338 = vmax.xlane.f32.xlu1 %v337_v41  ;;  %208 = vmax.xlane.f32.xlu2 %v207_v42 }
  0x9c   :  { %143 = vmax.xlane.f32.xlu0 %v142_v45 }
  0xa3   :  { %115 = vadd.xlane.f32.xlu1 %v114_v50  ;;  %335 = vmax.xlane.f32.xlu2 %v334_v51 }
  0xab   :  { %178 = vadd.xlane.f32.xlu1 %v177_v56  ;;  %181 = vadd.xlane.f32.xlu2 %v180_v57  ;;  %v242_v57 = vsel %vm70_vm8, %v240_v55, 0.0 }
  0xb0   :  { %232 = vperm.xlu0 %465, %v594_v6  }
  0xb8   :  { %469 = vset.pattern.permute.xlu0 %v543_v34 }
  0xc3   :  { %359 = vperm.xlu2 %467, %v585_v3  }
  0xc4   :  { %362 = vperm.xlu1 %468, %v594_v6  }
  0xda   :  { %112 = vadd.xlane.f32.xlu0 %v111_v60 }
  0xfe   :  { %v738_v0 = vpop.xlane.xlu2 %140  ;;  %v744_v4 = vpop.xlane.xlu1 %270 }
  0xff   :  { %v740_v1 = vpop.xlane.xlu0 %72  ;;  %v145_v10 = vsub.f32 %v641_v21, %v738_v0  ;;  %v275_v37 = vsub.f32 %v636_v20, %v744_v4 }
 0x100   :  { %v77_v2 = vsub.f32 %v646_v22, %v740_v1 }
 0x101   :  { %v147_v15 = vmul.f32 1.442695, %v145_v10  ;;  %v277_v44 = vmul.f32 1.442695, %v275_v37 }
 0x102   :  { %v79_v3 = vmul.f32 1.442695, %v77_v2  ;;  %v305_v2 = vmul.f32 %v446_v59, %v629_v18 }
 0x104   :  { %471 = vpow2.f32 %v79_v3  ;;  %v307_v3 = vsel %vm70_vm8, %v305_v2, 0.0 }
 0x106   :  { %v746_v5 = vpop.xlane.xlu2 %205  ;;  %v755_v12 = vpop.xlane.xlu1 %273 }
 0x107   :  { %v748_v6 = vpop.xlane.xlu0 %75  ;;  %v276_v21 = vsub.f32 %v663_v29, %v755_v12  ;;  %v210_v24 = vsub.f32 %v673_v31, %v746_v5 }
 0x108   :  { %v78_v7 = vsub.f32 %v668_v30, %v748_v6 }
 0x109   :  { %v279_v28 = vmul.f32 1.442695, %v276_v21  ;;  %v212_v30 = vmul.f32 1.442695, %v210_v24 }
 0x10a   :  { %v81_v8 = vmul.f32 1.442695, %v78_v7  ;;  %v472_v9 = vpop.eup %471 }
 0x10b   :  { %v83_v11 = vsel %vm70_vm8, %v472_v9, 0.0 }
 0x10c   :  { %473 = vpow2.f32 %v81_v8  ;;  %84 = vadd.xlane.f32.xlu1 %v83_v11 }
 0x10d   :  { %475 = vpow2.f32 %v147_v15 }
 0x10e   :  { %v757_v14 = vpop.xlane.xlu2 %208  ;;  %v774_v31 = vpop.xlane.xlu1 %338 }
 0x10f   :  { %v211_v16 = vsub.f32 %v695_v39, %v757_v14  ;;  %v761_v17 = vpop.xlane.xlu0 %143  ;;  %v341_v47 = vsub.f32 %v690_v38, %v774_v31  ;;  %v310_v38 = vsel %vm70_vm8, %v306_v54, 0.0 }
 0x110   :  { %v146_v19 = vsub.f32 %v701_v40, %v761_v17 }
 0x111   :  { %v214_v22 = vmul.f32 1.442695, %v211_v16  ;;  %v344_v53 = vmul.f32 1.442695, %v341_v47 }
 0x112   :  { %v149_v25 = vmul.f32 1.442695, %v146_v19  ;;  %v474_v26 = vpop.eup %473 }
 0x113   :  { %477 = vpow2.f32 %v214_v22  ;;  %v86_v27 = vsel %vm70_vm8, %v474_v26, 0.0  ;;  %v476_v29 = vpop.eup %475 }
 0x114   :  { %479 = vpow2.f32 %v149_v25  ;;  %87 = vadd.xlane.f32.xlu1 %v86_v27  ;;  %v151_v40 = vsel %vm70_vm8, %v476_v29, 0.0 }
 0x115   :  { %481 = vpow2.f32 %v279_v28 }
 0x116   :  { %v770_v32 = vpop.xlane.xlu2 %335  ;;  %483 = vpow2.f32 %v212_v30 }
 0x117   :  { %v340_v33 = vsub.f32 %v714_v49, %v770_v32  ;;  %v788_v49 = vpop.xlane.xlu1 %115 }
 0x119   :  { %v342_v34 = vmul.f32 1.442695, %v340_v33  ;;  %v478_v35 = vpop.eup %477 }
 0x11a   :  { %v480_v36 = vpop.eup %479  ;;  %v219_v39 = vsel %vm70_vm8, %v478_v35, 0.0 }
 0x11b   :  { %485 = vpow2.f32 %v342_v34  ;;  %220 = vadd.xlane.f32.xlu2 %v219_v39  ;;  %v154_v41 = vsel %vm70_vm8, %v480_v36, 0.0  ;;  %v482_v42 = vpop.eup %481 }
 0x11c   :  { %152 = vadd.xlane.f32.xlu1 %v151_v40  ;;  %155 = vadd.xlane.f32.xlu0 %v154_v41  ;;  %v484_v45 = vpop.eup %483  ;;  %487 = vpow2.f32 %v277_v44  ;;  %v284_v50 = vsel %vm70_vm8, %v482_v42, 0.0 }
 0x11d   :  { %v216_v51 = vsel %vm70_vm8, %v484_v45, 0.0  ;;  %489 = vpow2.f32 %v344_v53 }
 0x11e   :  { %v801_v60 = vpop.xlane.xlu2 %181 }
 0x11f   :  { %v803_v62 = vpop.xlane.xlu1 %178 }
 0x121   :  { %v486_v46 = vpop.eup %485 }
 0x122   :  { %v346_v20 = vsel %vm70_vm8, %v486_v46, 0.0  ;;  %v488_v56 = vpop.eup %487  ;;  %v233_v63 = vpop.permute.xlu0 %232 }
 0x123   :  { %347 = vadd.xlane.f32.xlu2 %v346_v20  ;;  %v281_v58 = vsel %vm70_vm8, %v488_v56, 0.0  ;;  %v490_v61 = vpop.eup %489  ;;  %vm235_vm6 = vcmp.eq.s32.totalorder %v611_v13, %v233_v63 }
 0x124   :  { %285 = vadd.xlane.f32.xlu1 %v284_v50  ;;  %217 = vadd.xlane.f32.xlu0 %v216_v51  ;;  %v349_v7 = vsel %vm70_vm8, %v490_v61, 0.0  ;;  %v445_v8 = vsel %vm235_vm6, 1.0, %v544_v43 }
 0x125   :  { %v241_v15 = vmul.f32 %v445_v8, %v648_v23 }
 0x126   :  { %v360_v10 = vpop.permute.xlu2 %359 }
 0x127   :  { %vm364_vm9 = vcmp.eq.s32.totalorder %v611_v13, %v360_v10  ;;  %v245_v21 = vsel %vm70_vm8, %v241_v15, 0.0 }
 0x128   :  { %v448_v22 = vsel %vm364_vm9, 1.0, %v544_v43 }
 0x129   :  { %v370_v24 = vmul.f32 %v448_v22, %v629_v18 }
 0x12b   :  { %311 = vadd.xlane.f32.xlu2 %v310_v38  ;;  %v372_v25 = vsel %vm70_vm8, %v370_v24, 0.0 }
 0x12c   :  { %243 = vadd.xlane.f32.xlu1 %v242_v57  ;;  %282 = vadd.xlane.f32.xlu0 %v281_v58 }
 0x134   :  { %308 = vadd.xlane.f32.xlu1 %v307_v3  ;;  %350 = vadd.xlane.f32.xlu0 %v349_v7 }
 0x136   :  { %v363_v9 = vpop.permute.xlu1 %362 }
 0x137   :  { %vm365_vm7 = vcmp.eq.s32.totalorder %v611_v13, %v363_v9  ;;  %v823_v13 = vld [vmem:[%s881_s4] sm:$0xff] }
 0x138   :  { %v449_v11 = vsel %vm365_vm7, 1.0, %v544_v43  ;;  %v396_v18 = vsel %vm123_vm10, %v823_v13, 0.0 }
 0x139   :  { %v371_v16 = vmul.f32 %v449_v11, %v648_v23  ;;  %v828_v23 = vld [vmem:[%s881_s4 + $0x8] sm:$0xff]  ;;  %s545_s4 = smov [#allocation2]  }
 0x13a   :  { %v397_v43 = vsel %vm123_vm10, %v828_v23, 0.0  ;;  %s427_s11 = sshll.u32 %s545_s4, 4  ;;  %s428_s11 = int_to_ptr.vmem [resolvable:$true] %s427_s11 }
 0x13b   :  { %v375_v19 = vsel %vm70_vm8, %v371_v16, 0.0  ;;  %v398_v29 = vadd.f32 %v397_v43, %v396_v18 }
 0x13c   :  { %246 = vadd.xlane.f32.xlu0 %v245_v21  ;;  %376 = vadd.xlane.f32.xlu1 %v375_v19 }
 0x13d   :  { %v399_v39 = vrot.slane %v398_v29, 4 }
 0x13f   :  { %v400_v50 = vadd.f32 %v399_v39, %v398_v29 }
 0x141   :  { %v401_v38 = vrot.slane %v400_v50, 2 }
 0x144   :  { %373 = vadd.xlane.f32.xlu0 %v372_v25 }
 0x14d   :  { %v113_v27 = vpop.xlane.xlu0 %112 }
 0x17f   :  { %v85_v26 = vpop.xlane.xlu1 %84 }
 0x187   :  { %v88_v28 = vpop.xlane.xlu1 %87 }
 0x188   :  { %491 = vlog2.f32 %v88_v28 }
 0x189   :  { %493 = vlog2.f32 %v85_v26 }
 0x18e   :  { %v492_v34 = vpop.eup %491  ;;  %v221_v35 = vpop.xlane.xlu2 %220 }
 0x18f   :  { %v153_v30 = vpop.xlane.xlu1 %152  ;;  %v156_v33 = vpop.xlane.xlu0 %155  ;;  %v92_v37 = vmul.f32 0.6931472, %v492_v34 }
 0x190   :  { %495 = vlog2.f32 %v153_v30  ;;  %v494_v36 = vpop.eup %493 }
 0x191   :  { %497 = vlog2.f32 %v156_v33  ;;  %v90_v42 = vmul.f32 0.6931472, %v494_v36  ;;  %v94_v47 = vadd.f32 %v92_v37, %v748_v6 }
 0x193   :  { %v93_v52 = vadd.f32 %v90_v42, %v740_v1  ;;  %v118_v56 = vsub.f32 %v94_v47, %v788_v49 }
 0x195   :  { %v117_v58 = vsub.f32 %v93_v52, %v113_v27  ;;  %v120_v2 = vmul.f32 %v118_v56, %v828_v23 }
 0x196   :  { %v496_v40 = vpop.eup %495  ;;  %v348_v55 = vpop.xlane.xlu2 %347 }
 0x197   :  { %v498_v41 = vpop.eup %497  ;;  %v158_v44 = vmul.f32 0.6931472, %v496_v40  ;;  %v286_v45 = vpop.xlane.xlu1 %285  ;;  %v125_v8 = vsel %vm123_vm10, %v120_v2, 0.0 }
 0x198   :  { %v218_v46 = vpop.xlane.xlu0 %217  ;;  %v160_v20 = vmul.f32 0.6931472, %v498_v41  ;;  %499 = vlog2.f32 %v286_v45 }
 0x199   :  { %v161_v48 = vadd.f32 %v158_v44, %v738_v0  ;;  %501 = vlog2.f32 %v218_v46 }
 0x19a   :  { %v162_v51 = vadd.f32 %v160_v20, %v761_v17 }
 0x19b   :  { %v183_v53 = vsub.f32 %v161_v48, %v803_v62  ;;  %v402_v62 = vadd.f32 %v401_v38, %v400_v50 }
 0x19c   :  { %v184_v54 = vsub.f32 %v162_v51, %v801_v60  ;;  %v119_v60 = vmul.f32 %v117_v58, %v823_v13 }
 0x19d   :  { %v185_v0 = vmul.f32 %v183_v53, %v823_v13  ;;  %v403_v9 = vrot.slane %v402_v62, 1 }
 0x19e   :  { %v500_v57 = vpop.eup %499  ;;  %v186_v17 = vmul.f32 %v184_v54, %v828_v23  ;;  %v312_v11 = vpop.xlane.xlu2 %311  ;;  %v124_v16 = vsel %vm123_vm10, %v119_v60, 0.0 }
 0x19f   :  { %v290_v59 = vmul.f32 0.6931472, %v500_v57  ;;  %v244_v6 = vpop.xlane.xlu1 %243  ;;  %v502_v1 = vpop.eup %501  ;;  %v189_v61 = vsel %vm123_vm10, %v185_v0, 0.0  ;;  %v126_v25 = vadd.f32 %v125_v8, %v124_v16  ;;  %v852_v28 = vadd.f32 %v403_v9, %v402_v62 }
 0x1a0   :  { %v283_v63 = vpop.xlane.xlu0 %282  ;;  %v190_v3 = vsel %vm123_vm10, %v186_v17, 0.0  ;;  %v223_v7 = vmul.f32 0.6931472, %v502_v1 }
 0x1a1   :  { %503 = vlog2.f32 %v283_v63  ;;  %v292_v49 = vadd.f32 %v290_v59, %v755_v12  ;;  %v191_v19 = vadd.f32 %v190_v3, %v189_v61  ;;  %v127_v29 = vrot.slane %v126_v25, 4 }
 0x1a2   :  { %505 = vlog2.f32 %v221_v35  ;;  %v226_v12 = vadd.f32 %v223_v7, %v746_v5  ;;  %vm410_vm8 = vweird.f32 %v852_v28 }
 0x1a3   :  { %v314_v21 = vsub.f32 %v292_v49, %v312_v11  ;;  %v192_v43 = vrot.slane %v191_v19, 4  ;;  %v128_v44 = vadd.f32 %v127_v29, %v126_v25 }
 0x1a4   :  { %v248_v34 = vsub.f32 %v226_v12, %v244_v6  ;;  %v416_v12 = vand.u32 2147483648, %v852_v28 }
 0x1a5   :  { %v316_v30 = vmul.f32 %v314_v21, %v828_v23  ;;  %v193_v39 = vadd.f32 %v192_v43, %v191_v19  ;;  %v129_v54 = vrot.slane %v128_v44, 2 }
 0x1a6   :  { %v250_v45 = vmul.f32 %v248_v34, %v823_v13  ;;  %v417_v29 = vor.u32 1.1754944e-38, %v416_v12 }
 0x1a7   :  { %v504_v10 = vpop.eup %503  ;;  %v309_v26 = vpop.xlane.xlu1 %308  ;;  %v130_v17 = vadd.f32 %v129_v54, %v128_v44 }
 0x1a8   :  { %v506_v15 = vpop.eup %505  ;;  %v288_v22 = vmul.f32 0.6931472, %v504_v10  ;;  %v351_v24 = vpop.xlane.xlu0 %350 }
 0x1a9   :  { %507 = vlog2.f32 %v351_v24  ;;  %v225_v18 = vmul.f32 0.6931472, %v506_v15  ;;  %v131_v8 = vrot.slane %v130_v17, 1 }
 0x1aa   :  { %509 = vlog2.f32 %v348_v55  ;;  %v291_v27 = vadd.f32 %v288_v22, %v744_v4  ;;  %v320_v4 = vsel %vm123_vm10, %v316_v30, 0.0  ;;  %v254_v55 = vsel %vm123_vm10, %v250_v45, 0.0 }
 0x1ab   :  { %511 = vrcp.f32 %v852_v28  ;;  %v227_v5 = vadd.f32 %v225_v18, %v757_v14  ;;  %v194_v14 = vrot.slane %v193_v39, 2  ;;  %v132_v22 = vadd.f32 %v131_v8, %v130_v17 }
 0x1ac   :  { %v313_v33 = vsub.f32 %v291_v27, %v309_v26 }
 0x1ad   :  { %v195_v6 = vadd.f32 %v194_v14, %v193_v39 }
 0x1ae   :  { %v315_v35 = vmul.f32 %v313_v33, %v823_v13 }
 0x1af   :  { %v508_v36 = vpop.eup %507  ;;  %v377_v53 = vpop.xlane.xlu1 %376  ;;  %v196_v61 = vrot.slane %v195_v6, 1 }
 0x1b0   :  { %v510_v37 = vpop.eup %509  ;;  %v319_v40 = vsel %vm123_vm10, %v315_v35, 0.0  ;;  %v355_v41 = vmul.f32 0.6931472, %v508_v36  ;;  %v247_v42 = vpop.xlane.xlu0 %246 }
 0x1b1   :  { %v321_v46 = vadd.f32 %v320_v4, %v319_v40  ;;  %v249_v20 = vsub.f32 %v227_v5, %v247_v42  ;;  %v353_v48 = vmul.f32 0.6931472, %v510_v37  ;;  %v512_v51 = vpop.eup %511 }
 0x1b2   :  { %v357_v47 = vadd.f32 %v355_v41, %v774_v31  ;;  %v406_v59 = vmul.f32 %v512_v51, %v852_v28  ;;  %vm411_vm11 = vweird.f32 %v512_v51 }
 0x1b3   :  { %v251_v50 = vmul.f32 %v249_v20, %v828_v23  ;;  %v322_v52 = vrot.slane %v321_v46, 4  ;;  %v356_v58 = vadd.f32 %v353_v48, %v770_v32  ;;  %vm412_vm12 = vmor %vm410_vm8, %vm411_vm11 }
 0x1b4   :  { %v379_v38 = vsub.f32 %v357_v47, %v377_v53  ;;  %v407_v49 = vsub.f32 1.0, %v406_v59 }
 0x1b5   :  { %v255_v56 = vsel %vm123_vm10, %v251_v50, 0.0  ;;  %v323_v31 = vadd.f32 %v322_v52, %v321_v46 }
 0x1b6   :  { %v256_v57 = vadd.f32 %v255_v56, %v254_v55  ;;  %v381_v1 = vmul.f32 %v379_v38, %v828_v23  ;;  %v408_v15 = vmul.f32 %v512_v51, %v407_v49  ;;  %v197_v23 = vadd.f32 %v196_v61, %v195_v6 }
 0x1b7   :  { %v324_v3 = vrot.slane %v323_v31, 2 }
 0x1b8   :  { %v257_v63 = vrot.slane %v256_v57, 4  ;;  %v374_v0 = vpop.xlane.xlu0 %373  ;;  %v385_v32 = vsel %vm123_vm10, %v381_v1, 0.0  ;;  %v198_v18 = vadd.f32 %v197_v23, %v132_v22  ;;  %v409_v43 = vadd.f32 %v512_v51, %v408_v15 }
 0x1b9   :  { %v378_v2 = vsub.f32 %v356_v58, %v374_v0  ;;  %v325_v16 = vadd.f32 %v324_v3, %v323_v31 }
 0x1ba   :  { %v258_v62 = vadd.f32 %v257_v63, %v256_v57  ;;  %v413_v36 = vsel %vm412_vm12, %v512_v51, %v409_v43 }
 0x1bb   :  { %v380_v60 = vmul.f32 %v378_v2, %v823_v13  ;;  %v414_v13 = vand.u32 2147483647, %v852_v28  ;;  %v326_v26 = vrot.slane %v325_v16, 1 }
 0x1bc   :  { %v259_v7 = vrot.slane %v258_v62, 2 }
 0x1bd   :  { %v384_v9 = vsel %vm123_vm10, %v380_v60, 0.0  ;;  %v327_v34 = vadd.f32 %v326_v26, %v325_v16  ;;  %vm415_vm13 = vcmp.eq.f32.partialorder %v414_v13, 8.507059e+37 }
 0x1be   :  { %v260_v10 = vadd.f32 %v259_v7, %v258_v62  ;;  %v386_v11 = vadd.f32 %v385_v32, %v384_v9  ;;  %v418_v39 = vsel %vm415_vm13, %v417_v29, %v413_v36 }
 0x1c0   :  { %v261_v19 = vrot.slane %v260_v10, 1  ;;  %v387_v21 = vrot.slane %v386_v11, 4 }
 0x1c2   :  { %v262_v24 = vadd.f32 %v261_v19, %v260_v10  ;;  %v388_v25 = vadd.f32 %v387_v21, %v386_v11 }
 0x1c4   :  { %v389_v27 = vrot.slane %v388_v25, 2  ;;  %v263_v33 = vadd.f32 %v262_v24, %v198_v18 }
 0x1c6   :  { %v390_v30 = vadd.f32 %v389_v27, %v388_v25  ;;  %v328_v5 = vadd.f32 %v327_v34, %v263_v33 }
 0x1c8   :  { %v391_v35 = vrot.slane %v390_v30, 1 }
 0x1ca   :  { %v392_v37 = vadd.f32 %v391_v35, %v390_v30 }
 0x1cc   :  { %v393_v28 = vadd.f32 %v392_v37, %v328_v5 }
 0x1ce   :  { %v419_v4 = vmul.f32 %v418_v39, %v393_v28 }
 0x1d0   :  { %421 = vst.msk [vmem:[#allocation2] sm:$0x1] %vm420_vm14, %v419_v4 }
 0x1d1   :  { %432 = dma.vmem_to_hbm [thread:$0]  %s428_s11, 16, %s430_s14, [#allocation3]  }
 0x1d2   :  { %537 = dma.done.wait [#allocation3], 16  }
 0x1d3   :  { %538 = vsyncadd [#allocation3], 4294967280 }
 0x1d4   :  { %437 = vsyncpa [#allocation3], 1 }

// kernel: mem_transformer_forward.5
= control target key start
LH: loop header
LB: loop body
LE: loop exit
PB: predicated region body
PF: predicated region fallthrough
CT: control target
= control target key end

     0   :  { %s1240_s18 = smov 0   ;;  %s1435_s0 = inlined_call_operand.vmem [shape: f32[16,32], index: 0, kind: input, shape index: {}]   ;;  %s1436_s1 = inlined_call_operand.vmem [shape: f32[8,32], index: 1, kind: input, shape index: {}]   ;;  %s1437_s2 = inlined_call_operand.vmem [shape: f32[32,96], index: 2, kind: input, shape index: {}]   ;;  %s1438_s3 = inlined_call_operand.vmem [shape: f32[32,32], index: 3, kind: input, shape index: {}]   ;;  %s1439_s4 = inlined_call_operand.vmem [shape: f32[32,32], index: 4, kind: input, shape index: {}]   ;;  %s1440_s5 = inlined_call_operand.vmem [shape: f32[2,16], index: 5, kind: input, shape index: {}]   ;;  %s1441_s6 = inlined_call_operand.vmem [shape: f32[2,16], index: 6, kind: input, shape index: {}]   ;;  %s1442_s7 = inlined_call_operand.vmem [shape: f32[1,32], index: 7, kind: input, shape index: {}]   ;;  %s1443_s8 = inlined_call_operand.vmem [shape: f32[1,32], index: 8, kind: input, shape index: {}]   ;;  %s1444_s9 = inlined_call_operand.vmem [shape: f32[32,64], index: 9, kind: input, shape index: {}]   ;;  %s1445_s10 = inlined_call_operand.vmem [shape: f32[1,64], index: 10, kind: input, shape index: {}]   ;;  %s1446_s11 = inlined_call_operand.vmem [shape: f32[64,32], index: 11, kind: input, shape index: {}]   ;;  %s1447_s12 = inlined_call_operand.vmem [shape: f32[1,32], index: 12, kind: input, shape index: {}]   ;;  %s1448_s13 = inlined_call_operand.vmem [shape: f32[1,32], index: 13, kind: input, shape index: {}]   ;;  %s1449_s14 = inlined_call_operand.vmem [shape: f32[1,32], index: 14, kind: input, shape index: {}]   ;;  %s1450_s15 = inlined_call_operand.vmem [shape: f32[16,32], index: 15, kind: output, shape index: {}]  }
   0x1 LB: > { %s1066_s19 = sadd.s32 4294967295, %s1143_s18   ;;  %p1070_p0 = scmp.ge.s32.totalorder %s1143_s18, 1  ;;  %s1143_s18 = sphi %s1240_s18, %s25_s18  }
   0x2   : > { %p436_p1 = scmp.lt.s32.totalorder %s1143_s18, 3 }
   0x4   : > { %p437_p2 = pnand %p1070_p0, %p436_p1 }
   0x5   : > { %p482_p3 = scmp.lt.s32.totalorder (!%p437_p2), %s1066_s19, 1  ;;  %s1145_s23 = smov (!%p437_p2), 16  }
   0x6   : > { %440 = sbr.rel (%p437_p2) target bundleno = 2095 (0x82f), region = 80  ;;  %s1147_s24 = smov (!%p437_p2), 96  }
   0x7   : > { %s1148_s27 = smov (!%p437_p2), 112   ;;  %s1149_s16 = smov (!%p437_p2), 3  }
   0x8   : > { %s1150_s17 = smov (!%p437_p2), 2   ;;  %s1151_s20 = smov (!%p437_p2), 1  }
   0x9   : > { %s1152_s21 = smov (!%p437_p2), 6   ;;  %s1155_s25 = smov (!%p437_p2), 7  }
   0xa   : > { %s1156_s26 = smov (!%p437_p2), 121   ;;  %s1158_s28 = smov (!%p437_p2), 64  }
   0xb   : > { %v494_v0 = vld [vmem:[%s1437_s2 + $0x18] sm:$0xff]  ;;  %v493_v1 = vld [vmem:[%s1437_s2 + $0x10] sm:$0xff]  ;;  %v492_v2 = vld [vmem:[%s1437_s2 + $0x8] sm:$0xff]  ;;  %s1452_s19 = smov (!%p482_p3, %s1066_s19), 1  ;;  %vm495_vm0 = vcmask 261120   ;;  %vm558_vm1 = vcmask 130048   ;;  %v547_v60 = vlaneseq }
   0xc   : > { %511 = vmatpush.msra.mxu1 %v494_v0  ;;  %v1113_v3 = vld [vmem:[%s1441_s6 + $0x1] ss:$0 sm:$0xff]  ;;  %s1071_s30 = sshll.u32 %s1452_s19, 3  ;;  %v523_v7 = vld [vmem:[%s1438_s3 + $0x18] sm:$0xff]  ;;  %v522_v8 = vld [vmem:[%s1438_s3 + $0x10] sm:$0xff]  ;;  %vm585_vm2 = vcmask 64512  }
   0xd   : > { %v491_v4 = vld [vmem:[%s1437_s2] sm:$0xff]  ;;  %s485_s22 = scalar_lea.vmem %s1435_s0, %s1071_s30  ;;  %704 = vrot.lane.b32.xlu0 %v1113_v3, %s1145_s23  ;;  %v521_v9 = vld [vmem:[%s1438_s3 + $0x8] sm:$0xff]  ;;  %vm609_vm3 = vcmask 1040384   ;;  %vm611_vm4 = vcmask 1041408   ;;  %vm613_vm5 = vcmask 1042432   ;;  %vm615_vm6 = vcmask 1043456  }
   0xe   : > { %512 = vmatpush.msra.mxu1 %v493_v1  ;;  %v1114_v5 = vld [vmem:[%s1440_s5 + $0x1] ss:$0 sm:$0xff]  ;;  %v1115_v15 = vld [vmem:[%s1441_s6] ss:$0 sm:$0xff]  ;;  %vm617_vm7 = vcmask 1044480   ;;  %vm619_vm8 = vcmask 1045504  }
   0xf   : > { %v1275_v6 = vld [vmem:[%s485_s22] sm:$0xff]  ;;  %697 = vrot.lane.b32.xlu2 %v1114_v5, %s1145_s23  ;;  %s1146_s22 = smov 80   ;;  %vm621_vm9 = vcmask 1046528   ;;  %v548_v61 = vshrl.u32 %v547_v60, 7  ;;  %v550_v62 = vand.u32 127, %v547_v60  ;;  %vm955_vm15 = vcmask 523264  }
  0x10   : > { %513 = vmatpush.msra.mxu1 %v492_v2  ;;  %v520_v10 = vld [vmem:[%s1438_s3] sm:$0xff] }
  0x11   : > { %v519_v11 = vld [vmem:[%s1436_s1] sm:$0xff]  ;;  %vm551_vm10 = vcmp.gt.s32.totalorder %v550_v62, %v548_v61  ;;  %v946_v62 = vld [vmem:[%s1446_s11 + $0x18] sm:$0xff] }
  0x12   : > { %514 = vmatpush.msra.mxu1 %v491_v4  ;;  %v1116_v21 = vld [vmem:[%s1440_s5] ss:$0 sm:$0xff] }
  0x13   : > { %1073 = vmatmul.msk.f32.vlgmr.msra.gmra.mxu1 %vm495_vm0, %v1275_v6  ;;  %v947_v60 = vld [vmem:[%s1446_s11 + $0x20] sm:$0xff] }
  0x14   : > { %539 = vmatpush.msrb.mxu1 %v523_v7 }
  0x16   : > { %540 = vmatpush.msrb.mxu1 %v522_v8 }
  0x18   : > { %541 = vmatpush.msrb.mxu1 %v521_v9 }
  0x1a   : > { %542 = vmatpush.msrb.mxu1 %v520_v10 }
  0x1b   : > { %1074 = vmatmul.msk.f32.vlgmr.msrb.gmra.mxu1 %vm495_vm0, %v519_v11 }
  0x69   : > { %v698_v13 = vpop.permute.xlu2 %697 }
  0x7f   : > { %v705_v18 = vpop.permute.xlu0 %704 }
  0x90   : > { %v1296_v12 = vpop.f32.mrf.mxu1 }
  0x91   : > { %770 = vrot.lane.b32.xlu2 %v1296_v12, %s1146_s22  ;;  %624 = vrot.lane.b32.xlu0 %v1296_v12, %s1147_s24  ;;  %v700_v14 = vadd.f32 %v698_v13, %v1296_v12  ;;  %v557_v17 = vadd.f32 %v1115_v15, %v1296_v12  ;;  %v707_v19 = vadd.f32 %v705_v18, %v1296_v12  ;;  %s1153_s22 = smov 5   ;;  %s1154_s24 = smov 4  }
  0x92   : > { %v554_v23 = vadd.f32 %v1116_v21, %v1296_v12 }
  0x98   : > { %v544_v16 = vpop.f32.mrf.mxu1 }
  0x99   : > { %768 = vrot.lane.b32.xlu0 %v700_v14, %s1148_s27  ;;  %711 = vrot.lane.b32.xlu1 %v544_v16, %s1148_s27 }
  0x9a   : > { %1075 = vmatpush.xpose.msk.msra.mxu2 %vm558_vm1, %v544_v16 }
  0x9d   : > { %1076 = vmatmul.msk.f32.vlgmr.msra.gmra.mxu2 %vm558_vm1, %v557_v17 }
  0xa1   : > { %709 = vrot.lane.b32.xlu1 %v707_v19, %s1148_s27  ;;  %s1157_s27 = smov 48  }
  0xeb   : > { %v771_v20 = vpop.permute.xlu2 %770 }
  0xec   : > { %1082 = vmatpush.xpose.msk.msra.mxu0 %vm558_vm1, %v771_v20 }
 0x103   : > { %v625_v22 = vpop.permute.xlu0 %624 }
 0x104   : > { %1077 = vmatpush.xpose.msk.msra.mxu3 %vm558_vm1, %v625_v22 }
 0x107   : > { %1078 = vmatmul.msk.f32.vlgmr.msra.gmra.mxu3 %vm558_vm1, %v554_v23 }
 0x10b   : > { %v769_v24 = vpop.permute.xlu0 %768  ;;  %v712_v25 = vpop.permute.xlu1 %711 }
 0x10c   : > { %1080 = vmatpush.xpose.msk.msrb.mxu3 %vm558_vm1, %v712_v25  ;;  %1083 = vmatmul.msk.f32.vlgmr.msra.gmra.mxu0 %vm558_vm1, %v769_v24 }
 0x113   : > { %v710_v26 = vpop.permute.xlu1 %709 }
 0x114   : > { %1081 = vmatmul.msk.f32.vlgmr.msrb.gmra.mxu3 %vm558_vm1, %v710_v26 }
 0x120   : > { %v582_v30 = vpop.f32.mrf.mxu2 }
 0x121   : > { %v586_v31 = vsel %vm585_vm2, %v582_v30, 0.0  ;;  %v847_v30 = vld [vmem:[%s1439_s4 + $0x18] sm:$0xff] }
 0x189   : > { %v797_v63 = vpop.f32.mrf.mxu0 }
 0x18a   : > { %v1318_v27 = vpop.f32.mrf.mxu3 }
 0x197   : > { %v734_v28 = vpop.f32.mrf.mxu3 }
 0x198   : > { %v737_v29 = vsel %vm585_vm2, %v734_v28, 0.0 }
 0x199   : > { %745 = vrot.lane.b32.xlu0 %v737_v29, %s1149_s16  ;;  %742 = vrot.lane.b32.xlu2 %v737_v29, %s1150_s17 }
 0x19a   : > { %739 = vrot.lane.b32.xlu1 %v737_v29, %s1151_s20 }
 0x1a1   : > { %754 = vrot.lane.b32.xlu0 %v737_v29, %s1152_s21  ;;  %751 = vrot.lane.b32.xlu2 %v737_v29, %s1153_s22 }
 0x1a2   : > { %748 = vrot.lane.b32.xlu1 %v737_v29, %s1154_s24 }
 0x1a9   : > { %591 = vrot.lane.b32.xlu0 %v586_v31, %s1150_s17  ;;  %588 = vrot.lane.b32.xlu2 %v586_v31, %s1151_s20 }
 0x1aa   : > { %757 = vrot.lane.b32.xlu1 %v737_v29, %s1155_s25 }
 0x1b1   : > { %600 = vrot.lane.b32.xlu0 %v586_v31, %s1153_s22  ;;  %597 = vrot.lane.b32.xlu2 %v586_v31, %s1154_s24 }
 0x1b2   : > { %594 = vrot.lane.b32.xlu1 %v586_v31, %s1149_s16 }
 0x1b9   : > { %606 = vrot.lane.b32.xlu2 %v586_v31, %s1155_s25 }
 0x1ba   : > { %603 = vrot.lane.b32.xlu1 %v586_v31, %s1152_s21 }
 0x1f3   : > { %v743_v32 = vpop.permute.xlu2 %742 }
 0x1fb   : > { %v752_v35 = vpop.permute.xlu2 %751 }
 0x203   : > { %v589_v42 = vpop.permute.xlu2 %588 }
 0x204   : > { %v610_v49 = vsel %vm609_vm3, %v586_v31, %v589_v42  ;;  %v845_v31 = vld [vmem:[%s1439_s4 + $0x8] sm:$0xff] }
 0x20b   : > { %v746_v34 = vpop.permute.xlu0 %745  ;;  %v598_v48 = vpop.permute.xlu2 %597 }
 0x20c   : > { %v740_v33 = vpop.permute.xlu1 %739 }
 0x20d   : > { %v760_v36 = vsel %vm609_vm3, %v737_v29, %v740_v33 }
 0x20e   : > { %v761_v37 = vsel %vm611_vm4, %v760_v36, %v743_v32  ;;  %v844_v32 = vld [vmem:[%s1439_s4] sm:$0xff] }
 0x20f   : > { %v762_v39 = vsel %vm613_vm5, %v761_v37, %v746_v34 }
 0x213   : > { %v755_v41 = vpop.permute.xlu0 %754  ;;  %v607_v57 = vpop.permute.xlu2 %606 }
 0x214   : > { %v749_v38 = vpop.permute.xlu1 %748 }
 0x215   : > { %v763_v40 = vsel %vm615_vm6, %v762_v39, %v749_v38 }
 0x216   : > { %v764_v43 = vsel %vm617_vm7, %v763_v40, %v752_v35  ;;  %v1159_v40 = vmov 32.0  }
 0x217   : > { %v765_v45 = vsel %vm619_vm8, %v764_v43, %v755_v41 }
 0x21b   : > { %v592_v47 = vpop.permute.xlu0 %591 }
 0x21c   : > { %v758_v44 = vpop.permute.xlu1 %757  ;;  %v612_v51 = vsel %vm611_vm4, %v610_v49, %v592_v47 }
 0x21d   : > { %v766_v46 = vsel %vm621_vm9, %v765_v45, %v758_v44 }
 0x21e   : > { %773 = vrot.lane.b32.xlu0 %v766_v46, %s1156_s26 }
 0x223   : > { %v601_v54 = vpop.permute.xlu0 %600 }
 0x224   : > { %v595_v50 = vpop.permute.xlu1 %594 }
 0x225   : > { %v614_v52 = vsel %vm613_vm5, %v612_v51, %v595_v50  ;;  %v914_v51 = vld [vmem:[%s1444_s9 + $0x18] sm:$0xff] }
 0x226   : > { %v616_v53 = vsel %vm615_vm6, %v614_v52, %v598_v48  ;;  %934 = vmatpush.msra.mxu3 %v914_v51  ;;  %v913_v52 = vld [vmem:[%s1444_s9 + $0x10] sm:$0xff] }
 0x227   : > { %v618_v55 = vsel %vm617_vm7, %v616_v53, %v601_v54  ;;  %v912_v53 = vld [vmem:[%s1444_s9 + $0x8] sm:$0xff]  ;;  %v911_v54 = vld [vmem:[%s1444_s9] sm:$0xff] }
 0x228   : > { %935 = vmatpush.msra.mxu3 %v913_v52 }
 0x22a   : > { %936 = vmatpush.msra.mxu3 %v912_v53 }
 0x22c   : > { %v604_v56 = vpop.permute.xlu1 %603  ;;  %937 = vmatpush.msra.mxu3 %v911_v54 }
 0x22d   : > { %v620_v58 = vsel %vm619_vm8, %v618_v55, %v604_v56  ;;  %v950_v55 = vld [vmem:[%s1446_s11 + $0x38] sm:$0xff]  ;;  %v949_v56 = vld [vmem:[%s1446_s11 + $0x30] sm:$0xff] }
 0x22e   : > { %v622_v59 = vsel %vm621_vm9, %v620_v58, %v607_v57  ;;  %967 = vmatpush.msrb.mxu0 %v950_v55  ;;  %v948_v57 = vld [vmem:[%s1446_s11 + $0x28] sm:$0xff] }
 0x22f   : > { %627 = vrot.lane.b32.xlu1 %v622_v59, %s1156_s26 }
 0x230   : > { %968 = vmatpush.msrb.mxu0 %v949_v56 }
 0x232   : > { %969 = vmatpush.msrb.mxu0 %v948_v57 }
 0x234   : > { %970 = vmatpush.msrb.mxu0 %v947_v60 }
 0x236   : > { %971 = vmatpush.msrb.mxu0 %v946_v62 }
 0x290   : > { %v774_v0 = vpop.permute.xlu0 %773 }
 0x291   : > { %v798_v1 = vadd.f32 %v797_v63, %v774_v0 }
 0x293   : > { %v800_v2 = vmul.f32 0.25, %v798_v1 }
 0x295   : > { %v801_v3 = vsel %vm551_vm10, -1e+30, %v800_v2 }
 0x296   : > { %v802_v4 = vsel %vm585_vm2, %v801_v3, -inf }
 0x297   : > { %803 = vmax.xlane.f32.xlu2 %v802_v4 }
 0x2a1   : > { %v628_v5 = vpop.permute.xlu1 %627 }
 0x2a2   : > { %v653_v7 = vadd.f32 %v1318_v27, %v628_v5  ;;  %v1117_v5 = vld [vmem:[%s1442_s7] ss:$0 sm:$0xff] }
 0x2a4   : > { %v655_v8 = vmul.f32 0.25, %v653_v7 }
 0x2a6   : > { %v656_v9 = vsel %vm551_vm10, -1e+30, %v655_v8 }
 0x2a7   : > { %v657_v10 = vsel %vm585_vm2, %v656_v9, -inf }
 0x2a8   : > { %658 = vmax.xlane.f32.xlu0 %v657_v10 }
 0x2af   : > { %813 = vrot.lane.b32.xlu2 %v1296_v12, %s1157_s27  ;;  %s489_s27 = scalar_lea.vmem %s1450_s15, %s1071_s30 }
 0x30a   : > { %v804_v11 = vpop.xlane.xlu2 %803 }
 0x30b   : > { %v805_v13 = vsub.f32 %v801_v3, %v804_v11 }
 0x30d   : > { %v806_v14 = vmul.f32 1.442695, %v805_v13  ;;  %v945_v13 = vld [vmem:[%s1446_s11 + $0x10] sm:$0xff] }
 0x30e   : > { %972 = vmatpush.msrb.mxu0 %v945_v13 }
 0x30f   : > { %1123 = vpow2.f32 %v806_v14  ;;  %v944_v14 = vld [vmem:[%s1446_s11 + $0x8] sm:$0xff] }
 0x310   : > { %973 = vmatpush.msrb.mxu0 %v944_v14 }
 0x312   : > { %v814_v15 = vpop.permute.xlu2 %813 }
 0x313   : > { %834 = vmatpush.msra.mxu1 %v814_v15  ;;  %v943_v15 = vld [vmem:[%s1446_s11] sm:$0xff] }
 0x314   : > { %974 = vmatpush.msrb.mxu0 %v943_v15 }
 0x315   : > { %v1124_v16 = vpop.eup %1123 }
 0x316   : > { %v808_v17 = vsel %vm585_vm2, %v1124_v16, 0.0 }
 0x317   : > { %809 = vadd.xlane.f32.xlu1 %v808_v17 }
 0x31b   : > { %v659_v18 = vpop.xlane.xlu0 %658 }
 0x31c   : > { %v660_v19 = vsub.f32 %v656_v9, %v659_v18  ;;  %v1118_v9 = vld [vmem:[%s1443_s8] ss:$0 sm:$0xff] }
 0x31e   : > { %v661_v20 = vmul.f32 1.442695, %v660_v19 }
 0x320   : > { %1125 = vpow2.f32 %v661_v20  ;;  %v1120_v20 = vld [vmem:[%s1447_s12] ss:$0 sm:$0xff] }
 0x326   : > { %v1126_v21 = vpop.eup %1125 }
 0x327   : > { %v663_v22 = vsel %vm585_vm2, %v1126_v21, 0.0 }
 0x328   : > { %664 = vadd.xlane.f32.xlu0 %v663_v22 }
 0x330   : > { %668 = vrot.lane.b32.xlu1 %v1296_v12, %s1158_s28  ;;  %v846_v12 = vld [vmem:[%s1439_s4 + $0x10] sm:$0xff] }
 0x38a   : > { %v810_v23 = vpop.xlane.xlu1 %809 }
 0x38b   : > { %1127 = vrcp.f32 %v810_v23 }
 0x391   : > { %v1128_v24 = vpop.eup %1127 }
 0x392   : > { %v812_v25 = vmul.f32 %v1128_v24, %v1124_v16  ;;  %v1119_v16 = vld [vmem:[%s1445_s10] ss:$0 sm:$0xff] }
 0x394   : > { %1084 = vmatmul.msk.f32.vlgmr.msra.gmra.mxu1 %vm585_vm2, %v812_v25 }
 0x39b   : > { %v665_v26 = vpop.xlane.xlu0 %664 }
 0x39c   : > { %1129 = vrcp.f32 %v665_v26 }
 0x39d   : > { %1131 = vrcp.f32 %v1159_v40  ;;  %v1122_v40 = vld [vmem:[%s1449_s14] ss:$0 sm:$0xff] }
 0x3a2   : > { %v1130_v27 = vpop.eup %1129  ;;  %v669_v28 = vpop.permute.xlu1 %668 }
 0x3a3   : > { %689 = vmatpush.msrb.mxu2 %v669_v28  ;;  %v667_v29 = vmul.f32 %v1130_v27, %v1126_v21  ;;  %v1132_v41 = vpop.eup %1131 }
 0x3a4   : > { %v876_v42 = vmul.f32 32.0, %v1132_v41  ;;  %vm880_vm11 = vweird.f32 %v1132_v41 }
 0x3a5   : > { %1079 = vmatmul.msk.f32.vlgmr.msrb.gmra.mxu2 %vm585_vm2, %v667_v29 }
 0x3a6   : > { %863 = vmatpush.msra.mxu2 %v847_v30  ;;  %v877_v43 = vsub.f32 1.0, %v876_v42 }
 0x3a8   : > { %864 = vmatpush.msra.mxu2 %v846_v12  ;;  %v878_v44 = vmul.f32 %v1132_v41, %v877_v43 }
 0x3aa   : > { %865 = vmatpush.msra.mxu2 %v845_v31  ;;  %v879_v45 = vadd.f32 %v1132_v41, %v878_v44 }
 0x3ac   : > { %866 = vmatpush.msra.mxu2 %v844_v32  ;;  %v1362_v46 = vsel %vm880_vm11, %v1132_v41, %v879_v45 }
 0x411   : > { %v836_v33 = vpop.f32.mrf.mxu1 }
 0x412   : > { %840 = vrot.lane.b32.xlu0 %v836_v33, %s1145_s23 }
 0x428   : > { %v691_v34 = vpop.f32.mrf.mxu2 }
 0x484   : > { %v841_v35 = vpop.permute.xlu0 %840 }
 0x485   : > { %v843_v36 = vsel %vm558_vm1, %v691_v34, %v841_v35 }
 0x486   : > { %1085 = vmatmul.msk.f32.vlgmr.msra.gmra.mxu2 %vm495_vm0, %v843_v36 }
 0x509   : > { %v868_v37 = vpop.f32.mrf.mxu2 }
 0x50a   : > { %v871_v38 = vadd.f32 %v868_v37, %v1275_v6 }
 0x50c   : > { %v872_v39 = vsel %vm495_vm0, %v871_v38, 0.0 }
 0x50d   : > { %873 = vadd.xlane.f32.xlu2 %v872_v39 }
 0x580   : > { %v874_v47 = vpop.xlane.xlu2 %873 }
 0x581   : > { %v882_v48 = vmul.f32 %v1362_v46, %v874_v47 }
 0x583   : > { %v883_v49 = vsub.f32 %v871_v38, %v882_v48  ;;  %v1121_v38 = vld [vmem:[%s1448_s13] ss:$0 sm:$0xff] }
 0x585   : > { %v884_v50 = vmul.f32 %v883_v49, %v883_v49 }
 0x587   : > { %v885_v6 = vsel %vm495_vm0, %v884_v50, 0.0 }
 0x588   : > { %886 = vadd.xlane.f32.xlu1 %v885_v6 }
 0x5fb   : > { %v887_v58 = vpop.xlane.xlu1 %886 }
 0x5fc   : > { %v888_v59 = vmul.f32 %v887_v58, %v1362_v46 }
 0x5fe   : > { %v889_v61 = vadd.f32 1e-05, %v888_v59 }
 0x600   : > { %1133 = vrsqrt.f32 %v889_v61  ;;  %vm896_vm13 = vweird.f32 %v889_v61 }
 0x606   : > { %v1134_v63 = vpop.eup %1133 }
 0x607   : > { %v891_v0 = vmul.f32 %v1134_v63, %v889_v61  ;;  %vm897_vm12 = vweird.f32 %v1134_v63 }
 0x608   : > { %vm898_vm14 = vmor %vm896_vm13, %vm897_vm12 }
 0x609   : > { %v892_v1 = vmul.f32 %v1134_v63, %v891_v0 }
 0x60b   : > { %v893_v2 = vmul.f32 0.5, %v892_v1 }
 0x60d   : > { %v894_v3 = vsub.f32 1.5, %v893_v2 }
 0x60f   : > { %v895_v4 = vmul.f32 %v1134_v63, %v894_v3 }
 0x611   : > { %v899_v7 = vsel %vm898_vm14, %v1134_v63, %v895_v4 }
 0x612   : > { %v900_v8 = vmul.f32 %v899_v7, %v883_v49 }
 0x614   : > { %v905_v10 = vmul.f32 %v1117_v5, %v900_v8 }
 0x616   : > { %v910_v11 = vadd.f32 %v1118_v9, %v905_v10 }
 0x618   : > { %1086 = vmatmul.msk.f32.vlgmr.msra.gmra.mxu3 %vm495_vm0, %v910_v11 }
 0x69b   : > { %v939_v17 = vpop.f32.mrf.mxu3 }
 0x69c   : > { %v940_v18 = vadd.f32 %v1119_v16, %v939_v17 }
 0x69e   : > { %v942_v19 = vmax.f32 %v940_v18, 0.0 }
 0x6a0   : > { %1087 = vmatmul.msk.f32.vlgmr.msrb.gmra.mxu0 %vm955_vm15, %v942_v19 }
 0x71d   : > { %v976_v21 = vpop.f32.mrf.mxu0 }
 0x71e   : > { %v977_v22 = vadd.f32 %v1120_v20, %v976_v21 }
 0x720   : > { %v979_v23 = vadd.f32 %v977_v22, %v910_v11 }
 0x722   : > { %v980_v24 = vsel %vm495_vm0, %v979_v23, 0.0 }
 0x723   : > { %981 = vadd.xlane.f32.xlu0 %v980_v24 }
 0x796   : > { %v982_v25 = vpop.xlane.xlu0 %981 }
 0x797   : > { %v983_v26 = vmul.f32 %v982_v25, %v1362_v46 }
 0x799   : > { %v984_v27 = vsub.f32 %v979_v23, %v983_v26 }
 0x79b   : > { %v985_v28 = vmul.f32 %v984_v27, %v984_v27 }
 0x79d   : > { %v986_v29 = vsel %vm495_vm0, %v985_v28, 0.0 }
 0x79e   : > { %987 = vadd.xlane.f32.xlu2 %v986_v29 }
 0x811   : > { %v988_v30 = vpop.xlane.xlu2 %987 }
 0x812   : > { %v989_v12 = vmul.f32 %v988_v30, %v1362_v46 }
 0x814   : > { %v990_v31 = vadd.f32 1e-05, %v989_v12 }
 0x816   : > { %1135 = vrsqrt.f32 %v990_v31  ;;  %vm997_vm2 = vweird.f32 %v990_v31 }
 0x81c   : > { %v1136_v32 = vpop.eup %1135 }
 0x81d   : > { %v992_v33 = vmul.f32 %v1136_v32, %v990_v31  ;;  %vm998_vm1 = vweird.f32 %v1136_v32 }
 0x81e   : > { %vm999_vm3 = vmor %vm997_vm2, %vm998_vm1 }
 0x81f   : > { %v993_v34 = vmul.f32 %v1136_v32, %v992_v33 }
 0x821   : > { %v994_v35 = vmul.f32 0.5, %v993_v34 }
 0x823   : > { %v995_v36 = vsub.f32 1.5, %v994_v35 }
 0x825   : > { %v996_v37 = vmul.f32 %v1136_v32, %v995_v36 }
 0x827   : > { %v1000_v39 = vsel %vm999_vm3, %v1136_v32, %v996_v37 }
 0x828   : > { %v1001_v41 = vmul.f32 %v1000_v39, %v984_v27 }
 0x82a   : > { %v1006_v42 = vmul.f32 %v1121_v38, %v1001_v41 }
 0x82c   : > { %v1011_v43 = vadd.f32 %v1122_v40, %v1006_v42 }
 0x82e   : > { %1012 = vst.msk [vmem:[%s489_s27] sm:$0xff] %vm495_vm0, %v1011_v43 }
 0x82f PF: > { %s25_s18 = sadd.s32 1, %s1143_s18  }
 0x830   : > { %p22_p4 = scmp.ge.s32.totalorder %s25_s18, 4  }
 0x832   :  { %24 = sbr.rel (!%p22_p4) target bundleno = 1 (0x1), region = 110 }

</bundles_post_ra>
